<compile_context>
chip_gen: v7x
topology: tpu7x:2x2x1
jax: 0.10.0
libtpu: 0.0.40
codegen_flags: <defaults>
</compile_context>

<pallas_src>
import math
import functools

import jax
import jax.numpy as jnp
from jax import lax
from jax.experimental import pallas as pl
from jax.experimental.pallas import tpu as pltpu


# ----------------------------------------------------------------------------
# helpers
# ----------------------------------------------------------------------------
def _layer_norm(x, eps=1e-5):
    # torch.nn.LayerNorm constructed fresh in forward: weight=1, bias=0,
    # biased variance, eps=1e-5.
    mean = jnp.mean(x, axis=-1, keepdims=True)
    c = x - mean
    var = jnp.mean(c * c, axis=-1, keepdims=True)
    return c * lax.rsqrt(var + eps)


def make_positional_encoding(fix_len, d_model):
    position = jnp.arange(fix_len, dtype=jnp.float32)[:, None]
    div_term = jnp.exp(jnp.arange(0, d_model, 2, dtype=jnp.float32)
                       * (-math.log(10000.0) / d_model))
    pe = jnp.zeros((fix_len, d_model), dtype=jnp.float32)
    pe = pe.at[:, 0::2].set(jnp.sin(position * div_term))
    pe = pe.at[:, 1::2].set(jnp.cos(position * div_term))
    return pe


# ----------------------------------------------------------------------------
# single fused kernel: src_emb MLP + PE + n_layers encoder layers + out head
# grid over batch ("parallel"); static python loop over layers (weights
# stacked along a leading [L, ...] axis). Everything f32.
# ----------------------------------------------------------------------------
def encoder_kernel(x_ref, pad_ref, pe_ref,
                   ew1_ref, eb1_ref, ew2_ref, eb2_ref,
                   wq_ref, wk_ref, wv_ref, wo_ref, wff1_ref, wff2_ref,
                   ow1_ref, ob1_ref, ow2r_ref, ob2_ref,
                   out_ref, *attn_refs,
                   n_layers, n_heads, d_k, d_v):
    f32 = jnp.float32

    # ---- src embedding MLP (Linear+ReLU+Linear+ReLU) + positional encoding --
    xin = x_ref[0]                                                  # [S, F]
    h = jnp.dot(xin, ew1_ref[...], preferred_element_type=f32) + eb1_ref[...]
    h = jnp.maximum(h, 0.0)
    x = jnp.dot(h, ew2_ref[...], preferred_element_type=f32) + eb2_ref[...]
    x = jnp.maximum(x, 0.0)
    x = x + pe_ref[...]                                             # [S, D]
    # TODO(synk): dropout (p=0.1) is identity here (eval-mode semantics).

    S, D = x.shape
    key_pad = pad_ref[0] > 0.5        # [1, S] bool, hoisted out of layer loop
    scale = 1.0 / math.sqrt(d_k)
    neg_inf = f32(-1e9)

    for l in range(n_layers):                                       # static loop
        # ---- QKV projections: three lane-wide 2-D matmuls -------------------
        q2 = jnp.dot(x, wq_ref[l], preferred_element_type=f32)      # [S, H*dk]
        k2 = jnp.dot(x, wk_ref[l], preferred_element_type=f32)      # [S, H*dk]
        v2 = jnp.dot(x, wv_ref[l], preferred_element_type=f32)      # [S, H*dv]

        # ---- per-head S x S scores, stacked head-major, batched softmax -----
        scores = jnp.stack([
            jnp.dot(q2[:, h * d_k:(h + 1) * d_k],
                    k2[:, h * d_k:(h + 1) * d_k].T,
                    preferred_element_type=f32)
            for h in range(n_heads)]) * scale                        # [H, S, S]
        scores = jnp.where(key_pad, neg_inf, scores)                 # masked_fill_

        m = jnp.max(scores, axis=-1, keepdims=True)
        e = jnp.exp(scores - m)
        s = jnp.sum(e, axis=-1, keepdims=True)
        attn = e * pl.reciprocal(s, approx=True)                     # softmax
        attn_refs[l][0] = attn                                       # [H, S, S]

        # ---- per-head context, reassembled head-concat along lanes ----------
        context = jnp.concatenate([
            jnp.dot(attn[h], v2[:, h * d_v:(h + 1) * d_v],
                    preferred_element_type=f32)
            for h in range(n_heads)], axis=-1)                       # [S, H*dv]

        # ---- single output projection [S,H*dv] @ [H*dv,D] --------------------
        attn_out = jnp.dot(context, wo_ref[l], preferred_element_type=f32)
        x = _layer_norm(attn_out + x)                                # post-attn LN

        # ---- position-wise FFN ----------------------------------------------
        ff = jnp.dot(x, wff1_ref[l], preferred_element_type=f32)
        ff = jnp.maximum(ff, 0.0)
        ff = jnp.dot(ff, wff2_ref[l], preferred_element_type=f32)
        x = _layer_norm(ff + x)                                      # post-FFN LN

    # ---- output head: Linear + ReLU + (Linear -> 1) as VPU lane reduction ---
    h = jnp.dot(x, ow1_ref[...], preferred_element_type=f32) + ob1_ref[...]
    h = jnp.maximum(h, 0.0)                                          # [S, d_out_h]
    out_row = jnp.sum(h * ow2r_ref[...], axis=-1)[None, :] + ob2_ref[...]  # [1, S]
    out_ref[0] = out_row                                             # lane-dense


# ----------------------------------------------------------------------------
# one-time constant preparation (hoisted out of the per-call path)
# ----------------------------------------------------------------------------
def prepare_encoder_constants(params, seq_len, max_len):
    d_model = params["emb_w2"].shape[1]
    pe = make_positional_encoding(max_len, d_model)[:seq_len]        # [S, D]
    layers = params["layers"]
    return dict(
        pe=pe,
        ew1=params["emb_w1"], eb1=params["emb_b1"],
        ew2=params["emb_w2"], eb2=params["emb_b2"],
        wq=jnp.stack([p[0] for p in layers]),     # [L, D, H*dk]
        wk=jnp.stack([p[1] for p in layers]),     # [L, D, H*dk]
        wv=jnp.stack([p[2] for p in layers]),     # [L, D, H*dv]
        wo=jnp.stack([p[3] for p in layers]),     # [L, H*dv, D]
        wff1=jnp.stack([p[4] for p in layers]),   # [L, D, d_ff]
        wff2=jnp.stack([p[5] for p in layers]),   # [L, d_ff, D]
        ow1=params["out_w1"], ob1=params["out_b1"],
        ow2r=params["out_w2"].T,                  # [1, d_out_hidden]
        ob2=params["out_b2"],                     # [1, 1]
    )


_CONST_ORDER = ("pe", "ew1", "eb1", "ew2", "eb2", "wq", "wk", "wv", "wo",
                "wff1", "wff2", "ow1", "ob1", "ow2r", "ob2")


# ----------------------------------------------------------------------------
# per-call wrapper: pad-mask prep + single pallas_call
# ----------------------------------------------------------------------------
def encoder_forward(const, enc_inputs, mask_inputs, *, n_heads, d_k, d_v):
    B, S, F = enc_inputs.shape
    n_layers = const["wq"].shape[0]

    # pad mask: key positions where mask_inputs == 0; broadcast inside kernel.
    pad = (mask_inputs == 0).astype(jnp.float32).reshape(B, 1, S)    # [B, 1, S]

    const_args = [const[k] for k in _CONST_ORDER]

    kernel = functools.partial(encoder_kernel, n_layers=n_layers,
                               n_heads=n_heads, d_k=d_k, d_v=d_v)

    def full(shape):
        return pl.BlockSpec(shape, lambda b, _n=len(shape): (0,) * _n)

    in_specs = ([pl.BlockSpec((1, S, F), lambda b: (b, 0, 0)),       # enc_inputs
                 pl.BlockSpec((1, 1, S), lambda b: (b, 0, 0))]       # pad mask
                + [full(a.shape) for a in const_args])

    out_shapes = ((jax.ShapeDtypeStruct((B, 1, S), jnp.float32),)    # lane-dense
                  + tuple(jax.ShapeDtypeStruct((B, n_heads, S, S), jnp.float32)
                          for _ in range(n_layers)))
    out_specs = ((pl.BlockSpec((1, 1, S), lambda b: (b, 0, 0)),)
                 + tuple(pl.BlockSpec((1, n_heads, S, S),
                                      lambda b: (b, 0, 0, 0))
                         for _ in range(n_layers)))

    results = pl.pallas_call(
        kernel,
        out_shape=out_shapes,
        grid=(B,),
        in_specs=in_specs,
        out_specs=out_specs,
        compiler_params=pltpu.CompilerParams(
            dimension_semantics=("parallel",),
            vmem_limit_bytes=32 * 1024 * 1024),
    )(enc_inputs, pad, *const_args)

    out = jnp.transpose(results[0], (0, 2, 1))                       # [B, S, 1]
    attns = list(results[1:])                                        # L x [B,H,S,S]
    return out, attns


# ----------------------------------------------------------------------------
# deterministic parameter initialization (torch-layout equivalent, [in, out])
# ----------------------------------------------------------------------------
def init_params(key, features_dim, d_in_hidden, d_model, d_ff, d_k, d_v,
                n_layers, n_heads, d_out_hidden):
    def nrm(k, shape, scale=0.05):
        return scale * jax.random.normal(k, shape, dtype=jnp.float32)

    keys = jax.random.split(key, 8 + 6 * n_layers)
    it = iter(keys)
    params = {
        "emb_w1": nrm(next(it), (features_dim, d_in_hidden)),
        "emb_b1": nrm(next(it), (1, d_in_hidden)),
        "emb_w2": nrm(next(it), (d_in_hidden, d_model)),
        "emb_b2": nrm(next(it), (1, d_model)),
        "out_w1": nrm(next(it), (d_model, d_out_hidden)),
        "out_b1": nrm(next(it), (1, d_out_hidden)),
        "out_w2": nrm(next(it), (d_out_hidden, 1)),
        "out_b2": nrm(next(it), (1, 1)),
        "layers": [],
    }
    for _ in range(n_layers):
        params["layers"].append((
            nrm(next(it), (d_model, d_k * n_heads)),   # W_Q
            nrm(next(it), (d_model, d_k * n_heads)),   # W_K
            nrm(next(it), (d_model, d_v * n_heads)),   # W_V
            nrm(next(it), (d_v * n_heads, d_model)),   # fc
            nrm(next(it), (d_model, d_ff)),            # ffn W1
            nrm(next(it), (d_ff, d_model)),            # ffn W2
        ))
    return params


# ----------------------------------------------------------------------------
if __name__ == "__main__":
    # small config
    B, S = 2, 8
    features_dim, d_in_hidden, d_model = 8, 32, 32
    d_ff, d_k, d_v = 64, 8, 8
    n_layers, n_heads, d_out_hidden = 2, 4, 16
    max_len = 16

    key = jax.random.PRNGKey(0)
    k_par, k_in = jax.random.split(key)
    params = init_params(k_par, features_dim, d_in_hidden, d_model, d_ff,
                         d_k, d_v, n_layers, n_heads, d_out_hidden)

    enc_inputs = jax.random.normal(k_in, (B, S, features_dim), dtype=jnp.float32)
    # mask_inputs: 0 marks padded key positions
    mask_inputs = jnp.array(
        [[1, 1, 1, 1, 1, 1, 0, 0],
         [1, 1, 1, 1, 1, 1, 1, 1]], dtype=jnp.int32)

    # one-time constant prep (hoisted out of the per-call path), then jit the
    # per-call wrapper so the remaining mask/reshape ops fuse around the kernel.
    const = prepare_encoder_constants(params, S, max_len)
    fwd = jax.jit(functools.partial(encoder_forward,
                                    n_heads=n_heads, d_k=d_k, d_v=d_v))

    out, attns = fwd(const, enc_inputs, mask_inputs)
    out = jax.block_until_ready(out)
    attns = [jax.block_until_ready(a) for a in attns]

    assert out.shape == (B, S, 1)
    assert all(a.shape == (B, n_heads, S, S) for a in attns)
    assert bool(jnp.all(jnp.isfinite(out)))
    assert all(bool(jnp.all(jnp.isfinite(a))) for a in attns)
    # softmax rows should sum ~1 (approx reciprocal => loose tolerance)
    row_sums = jnp.sum(attns[0], axis=-1)
    assert bool(jnp.all(jnp.abs(row_sums - 1.0) < 5e-2))
    print("KERNEL_OK")
</pallas_src>

<mosaic_0001>
module attributes {stable_mosaic.version = 11 : i64} {
  func.func @encoder_kernel(%arg0: i32, %arg1: memref<1x8x8xf32, #tpu.memory_space<vmem>>, %arg2: memref<1x1x8xf32, #tpu.memory_space<vmem>>, %arg3: memref<8x32xf32, #tpu.memory_space<vmem>>, %arg4: memref<8x32xf32, #tpu.memory_space<vmem>>, %arg5: memref<1x32xf32, #tpu.memory_space<vmem>>, %arg6: memref<32x32xf32, #tpu.memory_space<vmem>>, %arg7: memref<1x32xf32, #tpu.memory_space<vmem>>, %arg8: memref<2x32x32xf32, #tpu.memory_space<vmem>>, %arg9: memref<2x32x32xf32, #tpu.memory_space<vmem>>, %arg10: memref<2x32x32xf32, #tpu.memory_space<vmem>>, %arg11: memref<2x32x32xf32, #tpu.memory_space<vmem>>, %arg12: memref<2x32x64xf32, #tpu.memory_space<vmem>>, %arg13: memref<2x64x32xf32, #tpu.memory_space<vmem>>, %arg14: memref<32x16xf32, #tpu.memory_space<vmem>>, %arg15: memref<1x16xf32, #tpu.memory_space<vmem>>, %arg16: memref<1x16xf32, #tpu.memory_space<vmem>>, %arg17: memref<1x1xf32, #tpu.memory_space<vmem>>, %arg18: memref<1x1x8xf32, #tpu.memory_space<vmem>>, %arg19: memref<1x4x8x8xf32, #tpu.memory_space<vmem>>, %arg20: memref<1x4x8x8xf32, #tpu.memory_space<vmem>>) attributes {dimension_semantics = [#tpu.dimension_semantics<parallel>], iteration_bounds = array<i64: 2>, scalar_prefetch = 0 : i64, scratch_operands = 0 : i64, tpu.core_type = #tpu.core_type<tc>, window_params = [{transform_indices = @transform_0, window_bounds = array<i64: 1, 8, 8>}, {transform_indices = @transform_1, window_bounds = array<i64: 1, 1, 8>}, {pipeline_mode = #tpu.pipeline_mode<synchronous>, transform_indices = @transform_2, window_bounds = array<i64: 8, 32>}, {pipeline_mode = #tpu.pipeline_mode<synchronous>, transform_indices = @transform_3, window_bounds = array<i64: 8, 32>}, {pipeline_mode = #tpu.pipeline_mode<synchronous>, transform_indices = @transform_4, window_bounds = array<i64: 1, 32>}, {pipeline_mode = #tpu.pipeline_mode<synchronous>, transform_indices = @transform_5, window_bounds = array<i64: 32, 32>}, {pipeline_mode = #tpu.pipeline_mode<synchronous>, transform_indices = @transform_6, window_bounds = array<i64: 1, 32>}, {pipeline_mode = #tpu.pipeline_mode<synchronous>, transform_indices = @transform_7, window_bounds = array<i64: 2, 32, 32>}, {pipeline_mode = #tpu.pipeline_mode<synchronous>, transform_indices = @transform_8, window_bounds = array<i64: 2, 32, 32>}, {pipeline_mode = #tpu.pipeline_mode<synchronous>, transform_indices = @transform_9, window_bounds = array<i64: 2, 32, 32>}, {pipeline_mode = #tpu.pipeline_mode<synchronous>, transform_indices = @transform_10, window_bounds = array<i64: 2, 32, 32>}, {pipeline_mode = #tpu.pipeline_mode<synchronous>, transform_indices = @transform_11, window_bounds = array<i64: 2, 32, 64>}, {pipeline_mode = #tpu.pipeline_mode<synchronous>, transform_indices = @transform_12, window_bounds = array<i64: 2, 64, 32>}, {pipeline_mode = #tpu.pipeline_mode<synchronous>, transform_indices = @transform_13, window_bounds = array<i64: 32, 16>}, {pipeline_mode = #tpu.pipeline_mode<synchronous>, transform_indices = @transform_14, window_bounds = array<i64: 1, 16>}, {pipeline_mode = #tpu.pipeline_mode<synchronous>, transform_indices = @transform_15, window_bounds = array<i64: 1, 16>}, {pipeline_mode = #tpu.pipeline_mode<synchronous>, transform_indices = @transform_16, window_bounds = array<i64: 1, 1>}, {transform_indices = @transform_17, window_bounds = array<i64: 1, 1, 8>}, {transform_indices = @transform_18, window_bounds = array<i64: 1, 4, 8, 8>}, {transform_indices = @transform_19, window_bounds = array<i64: 1, 4, 8, 8>}]} {
    %c0 = arith.constant 0 : index
    %c0_0 = arith.constant 0 : index
    %c0_1 = arith.constant 0 : index
    %0 = vector.load %arg1[%c0, %c0_0, %c0_1] : memref<1x8x8xf32, #tpu.memory_space<vmem>>, vector<1x8x8xf32>
    %1 = vector.shape_cast %0 : vector<1x8x8xf32> to vector<8x8xf32>
    %c0_2 = arith.constant 0 : index
    %c0_3 = arith.constant 0 : index
    %2 = vector.load %arg4[%c0_2, %c0_3] : memref<8x32xf32, #tpu.memory_space<vmem>>, vector<8x32xf32>
    %cst = arith.constant dense<0.000000e+00> : vector<8x32xf32>
    %3 = tpu.matmul %1, %2, %cst {dimension_numbers = #tpu.dot_dimension_numbers<[1], [0], [0], [1], [0, 0, 1, 1], [], []>} : vector<8x8xf32>, vector<8x32xf32>, vector<8x32xf32> -> vector<8x32xf32>
    %c0_4 = arith.constant 0 : index
    %c0_5 = arith.constant 0 : index
    %4 = vector.load %arg5[%c0_4, %c0_5] : memref<1x32xf32, #tpu.memory_space<vmem>>, vector<1x32xf32>
    %5 = vector.broadcast %4 : vector<1x32xf32> to vector<8x32xf32>
    %6 = arith.addf %3, %5 : vector<8x32xf32>
    %cst_6 = arith.constant 0.000000e+00 : f32
    %7 = vector.broadcast %cst_6 : f32 to vector<8x32xf32>
    %8 = arith.maximumf %6, %7 : vector<8x32xf32>
    %c0_7 = arith.constant 0 : index
    %c0_8 = arith.constant 0 : index
    %9 = vector.load %arg6[%c0_7, %c0_8] : memref<32x32xf32, #tpu.memory_space<vmem>>, vector<32x32xf32>
    %cst_9 = arith.constant dense<0.000000e+00> : vector<8x32xf32>
    %10 = tpu.matmul %8, %9, %cst_9 {dimension_numbers = #tpu.dot_dimension_numbers<[1], [0], [0], [1], [0, 0, 1, 1], [], []>} : vector<8x32xf32>, vector<32x32xf32>, vector<8x32xf32> -> vector<8x32xf32>
    %c0_10 = arith.constant 0 : index
    %c0_11 = arith.constant 0 : index
    %11 = vector.load %arg7[%c0_10, %c0_11] : memref<1x32xf32, #tpu.memory_space<vmem>>, vector<1x32xf32>
    %12 = vector.broadcast %11 : vector<1x32xf32> to vector<8x32xf32>
    %13 = arith.addf %10, %12 : vector<8x32xf32>
    %cst_12 = arith.constant 0.000000e+00 : f32
    %14 = vector.broadcast %cst_12 : f32 to vector<8x32xf32>
    %15 = arith.maximumf %13, %14 : vector<8x32xf32>
    %c0_13 = arith.constant 0 : index
    %c0_14 = arith.constant 0 : index
    %16 = vector.load %arg3[%c0_13, %c0_14] : memref<8x32xf32, #tpu.memory_space<vmem>>, vector<8x32xf32>
    %17 = arith.addf %15, %16 : vector<8x32xf32>
    %c0_15 = arith.constant 0 : index
    %c0_16 = arith.constant 0 : index
    %c0_17 = arith.constant 0 : index
    %18 = vector.load %arg2[%c0_15, %c0_16, %c0_17] : memref<1x1x8xf32, #tpu.memory_space<vmem>>, vector<1x1x8xf32>
    %19 = vector.shape_cast %18 : vector<1x1x8xf32> to vector<1x8xf32>
    %cst_18 = arith.constant 5.000000e-01 : f32
    %20 = vector.broadcast %cst_18 : f32 to vector<1x8xf32>
    %21 = arith.cmpf ogt, %19, %20 : vector<1x8xf32>
    %c0_19 = arith.constant 0 : index
    %c0_20 = arith.constant 0 : index
    %c0_21 = arith.constant 0 : index
    %22 = vector.load %arg8[%c0_19, %c0_20, %c0_21] : memref<2x32x32xf32, #tpu.memory_space<vmem>>, vector<1x32x32xf32>
    %23 = vector.shape_cast %22 : vector<1x32x32xf32> to vector<32x32xf32>
    %cst_22 = arith.constant dense<0.000000e+00> : vector<8x32xf32>
    %24 = tpu.matmul %17, %23, %cst_22 {dimension_numbers = #tpu.dot_dimension_numbers<[1], [0], [0], [1], [0, 0, 1, 1], [], []>} : vector<8x32xf32>, vector<32x32xf32>, vector<8x32xf32> -> vector<8x32xf32>
    %c0_23 = arith.constant 0 : index
    %c0_24 = arith.constant 0 : index
    %c0_25 = arith.constant 0 : index
    %25 = vector.load %arg9[%c0_23, %c0_24, %c0_25] : memref<2x32x32xf32, #tpu.memory_space<vmem>>, vector<1x32x32xf32>
    %26 = vector.shape_cast %25 : vector<1x32x32xf32> to vector<32x32xf32>
    %cst_26 = arith.constant dense<0.000000e+00> : vector<8x32xf32>
    %27 = tpu.matmul %17, %26, %cst_26 {dimension_numbers = #tpu.dot_dimension_numbers<[1], [0], [0], [1], [0, 0, 1, 1], [], []>} : vector<8x32xf32>, vector<32x32xf32>, vector<8x32xf32> -> vector<8x32xf32>
    %c0_27 = arith.constant 0 : index
    %c0_28 = arith.constant 0 : index
    %c0_29 = arith.constant 0 : index
    %28 = vector.load %arg10[%c0_27, %c0_28, %c0_29] : memref<2x32x32xf32, #tpu.memory_space<vmem>>, vector<1x32x32xf32>
    %29 = vector.shape_cast %28 : vector<1x32x32xf32> to vector<32x32xf32>
    %cst_30 = arith.constant dense<0.000000e+00> : vector<8x32xf32>
    %30 = tpu.matmul %17, %29, %cst_30 {dimension_numbers = #tpu.dot_dimension_numbers<[1], [0], [0], [1], [0, 0, 1, 1], [], []>} : vector<8x32xf32>, vector<32x32xf32>, vector<8x32xf32> -> vector<8x32xf32>
    %31 = vector.extract_strided_slice %24 {offsets = [0, 0], sizes = [8, 8], strides = [1, 1]} : vector<8x32xf32> to vector<8x8xf32>
    %32 = vector.extract_strided_slice %27 {offsets = [0, 0], sizes = [8, 8], strides = [1, 1]} : vector<8x32xf32> to vector<8x8xf32>
    %33 = tpu.transpose %32, [1, 0] : vector<8x8xf32> -> vector<8x8xf32>
    %cst_31 = arith.constant dense<0.000000e+00> : vector<8x8xf32>
    %34 = tpu.matmul %31, %33, %cst_31 {dimension_numbers = #tpu.dot_dimension_numbers<[1], [0], [0], [1], [0, 0, 1, 1], [], []>} : vector<8x8xf32>, vector<8x8xf32>, vector<8x8xf32> -> vector<8x8xf32>
    %35 = vector.extract_strided_slice %24 {offsets = [0, 8], sizes = [8, 8], strides = [1, 1]} : vector<8x32xf32> to vector<8x8xf32>
    %36 = vector.extract_strided_slice %27 {offsets = [0, 8], sizes = [8, 8], strides = [1, 1]} : vector<8x32xf32> to vector<8x8xf32>
    %37 = tpu.transpose %36, [1, 0] : vector<8x8xf32> -> vector<8x8xf32>
    %cst_32 = arith.constant dense<0.000000e+00> : vector<8x8xf32>
    %38 = tpu.matmul %35, %37, %cst_32 {dimension_numbers = #tpu.dot_dimension_numbers<[1], [0], [0], [1], [0, 0, 1, 1], [], []>} : vector<8x8xf32>, vector<8x8xf32>, vector<8x8xf32> -> vector<8x8xf32>
    %39 = vector.extract_strided_slice %24 {offsets = [0, 16], sizes = [8, 8], strides = [1, 1]} : vector<8x32xf32> to vector<8x8xf32>
    %40 = vector.extract_strided_slice %27 {offsets = [0, 16], sizes = [8, 8], strides = [1, 1]} : vector<8x32xf32> to vector<8x8xf32>
    %41 = tpu.transpose %40, [1, 0] : vector<8x8xf32> -> vector<8x8xf32>
    %cst_33 = arith.constant dense<0.000000e+00> : vector<8x8xf32>
    %42 = tpu.matmul %39, %41, %cst_33 {dimension_numbers = #tpu.dot_dimension_numbers<[1], [0], [0], [1], [0, 0, 1, 1], [], []>} : vector<8x8xf32>, vector<8x8xf32>, vector<8x8xf32> -> vector<8x8xf32>
    %43 = vector.extract_strided_slice %24 {offsets = [0, 24], sizes = [8, 8], strides = [1, 1]} : vector<8x32xf32> to vector<8x8xf32>
    %44 = vector.extract_strided_slice %27 {offsets = [0, 24], sizes = [8, 8], strides = [1, 1]} : vector<8x32xf32> to vector<8x8xf32>
    %45 = tpu.transpose %44, [1, 0] : vector<8x8xf32> -> vector<8x8xf32>
    %cst_34 = arith.constant dense<0.000000e+00> : vector<8x8xf32>
    %46 = tpu.matmul %43, %45, %cst_34 {dimension_numbers = #tpu.dot_dimension_numbers<[1], [0], [0], [1], [0, 0, 1, 1], [], []>} : vector<8x8xf32>, vector<8x8xf32>, vector<8x8xf32> -> vector<8x8xf32>
    %47 = vector.shape_cast %34 : vector<8x8xf32> to vector<1x8x8xf32>
    %48 = vector.shape_cast %38 : vector<8x8xf32> to vector<1x8x8xf32>
    %49 = vector.shape_cast %42 : vector<8x8xf32> to vector<1x8x8xf32>
    %50 = vector.shape_cast %46 : vector<8x8xf32> to vector<1x8x8xf32>
    %51 = tpu.concatenate %47, %48, %49, %50 in 0 : vector<1x8x8xf32>, vector<1x8x8xf32>, vector<1x8x8xf32>, vector<1x8x8xf32> -> vector<4x8x8xf32>
    %cst_35 = arith.constant 0.353553385 : f32
    %52 = vector.broadcast %cst_35 : f32 to vector<4x8x8xf32>
    %53 = arith.mulf %51, %52 : vector<4x8x8xf32>
    %cst_36 = arith.constant -1.000000e+09 : f32
    %54 = vector.shape_cast %21 : vector<1x8xi1> to vector<1x1x8xi1>
    %55 = vector.broadcast %54 : vector<1x1x8xi1> to vector<4x8x8xi1>
    %56 = vector.broadcast %cst_36 : f32 to vector<4x8x8xf32>
    %57 = arith.select %55, %56, %53 : vector<4x8x8xi1>, vector<4x8x8xf32>
    %cst_37 = arith.constant dense<0xFF800000> : vector<4x8xf32>
    %58 = vector.multi_reduction <maximumf>, %57, %cst_37 [2] : vector<4x8x8xf32> to vector<4x8xf32>
    %59 = vector.shape_cast %58 : vector<4x8xf32> to vector<4x8x1xf32>
    %60 = vector.broadcast %59 : vector<4x8x1xf32> to vector<4x8x8xf32>
    %61 = arith.subf %57, %60 : vector<4x8x8xf32>
    %62 = math.exp %61 : vector<4x8x8xf32>
    %cst_38 = arith.constant dense<0.000000e+00> : vector<4x8xf32>
    %63 = vector.multi_reduction <add>, %62, %cst_38 [2] : vector<4x8x8xf32> to vector<4x8xf32>
    %64 = vector.shape_cast %63 : vector<4x8xf32> to vector<4x8x1xf32>
    %65 = tpu.reciprocal %64 {approx = true} : vector<4x8x1xf32> -> vector<4x8x1xf32>
    %66 = vector.broadcast %65 : vector<4x8x1xf32> to vector<4x8x8xf32>
    %67 = arith.mulf %62, %66 : vector<4x8x8xf32>
    %c0_39 = arith.constant 0 : index
    %c0_40 = arith.constant 0 : index
    %c0_41 = arith.constant 0 : index
    %c0_42 = arith.constant 0 : index
    %68 = vector.load %arg19[%c0_39, %c0_40, %c0_41, %c0_42] : memref<1x4x8x8xf32, #tpu.memory_space<vmem>>, vector<1x4x8x8xf32>
    %69 = vector.shape_cast %68 : vector<1x4x8x8xf32> to vector<4x8x8xf32>
    %70 = vector.shape_cast %67 : vector<4x8x8xf32> to vector<1x4x8x8xf32>
    tpu.vector_store %arg19[%c0_39, %c0_40, %c0_41, %c0_42], %70 {strides = array<i32>} : memref<1x4x8x8xf32, #tpu.memory_space<vmem>>, vector<1x4x8x8xf32>,
    %71 = vector.extract_strided_slice %67 {offsets = [0, 0, 0], sizes = [1, 8, 8], strides = [1, 1, 1]} : vector<4x8x8xf32> to vector<1x8x8xf32>
    %72 = vector.shape_cast %71 : vector<1x8x8xf32> to vector<8x8xf32>
    %73 = vector.extract_strided_slice %30 {offsets = [0, 0], sizes = [8, 8], strides = [1, 1]} : vector<8x32xf32> to vector<8x8xf32>
    %cst_43 = arith.constant dense<0.000000e+00> : vector<8x8xf32>
    %74 = tpu.matmul %72, %73, %cst_43 {dimension_numbers = #tpu.dot_dimension_numbers<[1], [0], [0], [1], [0, 0, 1, 1], [], []>} : vector<8x8xf32>, vector<8x8xf32>, vector<8x8xf32> -> vector<8x8xf32>
    %75 = vector.extract_strided_slice %67 {offsets = [1, 0, 0], sizes = [1, 8, 8], strides = [1, 1, 1]} : vector<4x8x8xf32> to vector<1x8x8xf32>
    %76 = vector.shape_cast %75 : vector<1x8x8xf32> to vector<8x8xf32>
    %77 = vector.extract_strided_slice %30 {offsets = [0, 8], sizes = [8, 8], strides = [1, 1]} : vector<8x32xf32> to vector<8x8xf32>
    %cst_44 = arith.constant dense<0.000000e+00> : vector<8x8xf32>
    %78 = tpu.matmul %76, %77, %cst_44 {dimension_numbers = #tpu.dot_dimension_numbers<[1], [0], [0], [1], [0, 0, 1, 1], [], []>} : vector<8x8xf32>, vector<8x8xf32>, vector<8x8xf32> -> vector<8x8xf32>
    %79 = vector.extract_strided_slice %67 {offsets = [2, 0, 0], sizes = [1, 8, 8], strides = [1, 1, 1]} : vector<4x8x8xf32> to vector<1x8x8xf32>
    %80 = vector.shape_cast %79 : vector<1x8x8xf32> to vector<8x8xf32>
    %81 = vector.extract_strided_slice %30 {offsets = [0, 16], sizes = [8, 8], strides = [1, 1]} : vector<8x32xf32> to vector<8x8xf32>
    %cst_45 = arith.constant dense<0.000000e+00> : vector<8x8xf32>
    %82 = tpu.matmul %80, %81, %cst_45 {dimension_numbers = #tpu.dot_dimension_numbers<[1], [0], [0], [1], [0, 0, 1, 1], [], []>} : vector<8x8xf32>, vector<8x8xf32>, vector<8x8xf32> -> vector<8x8xf32>
    %83 = vector.extract_strided_slice %67 {offsets = [3, 0, 0], sizes = [1, 8, 8], strides = [1, 1, 1]} : vector<4x8x8xf32> to vector<1x8x8xf32>
    %84 = vector.shape_cast %83 : vector<1x8x8xf32> to vector<8x8xf32>
    %85 = vector.extract_strided_slice %30 {offsets = [0, 24], sizes = [8, 8], strides = [1, 1]} : vector<8x32xf32> to vector<8x8xf32>
    %cst_46 = arith.constant dense<0.000000e+00> : vector<8x8xf32>
    %86 = tpu.matmul %84, %85, %cst_46 {dimension_numbers = #tpu.dot_dimension_numbers<[1], [0], [0], [1], [0, 0, 1, 1], [], []>} : vector<8x8xf32>, vector<8x8xf32>, vector<8x8xf32> -> vector<8x8xf32>
    %87 = tpu.concatenate %74, %78, %82, %86 in 1 : vector<8x8xf32>, vector<8x8xf32>, vector<8x8xf32>, vector<8x8xf32> -> vector<8x32xf32>
    %c0_47 = arith.constant 0 : index
    %c0_48 = arith.constant 0 : index
    %c0_49 = arith.constant 0 : index
    %88 = vector.load %arg11[%c0_47, %c0_48, %c0_49] : memref<2x32x32xf32, #tpu.memory_space<vmem>>, vector<1x32x32xf32>
    %89 = vector.shape_cast %88 : vector<1x32x32xf32> to vector<32x32xf32>
    %cst_50 = arith.constant dense<0.000000e+00> : vector<8x32xf32>
    %90 = tpu.matmul %87, %89, %cst_50 {dimension_numbers = #tpu.dot_dimension_numbers<[1], [0], [0], [1], [0, 0, 1, 1], [], []>} : vector<8x32xf32>, vector<32x32xf32>, vector<8x32xf32> -> vector<8x32xf32>
    %91 = arith.addf %90, %17 : vector<8x32xf32>
    %cst_51 = arith.constant dense<0.000000e+00> : vector<8xf32>
    %92 = vector.multi_reduction <add>, %91, %cst_51 [1] : vector<8x32xf32> to vector<8xf32>
    %93 = vector.shape_cast %92 : vector<8xf32> to vector<8x1xf32>
    %cst_52 = arith.constant 3.200000e+01 : f32
    %94 = vector.broadcast %cst_52 : f32 to vector<8x1xf32>
    %95 = arith.divf %93, %94 : vector<8x1xf32>
    %96 = vector.broadcast %95 : vector<8x1xf32> to vector<8x32xf32>
    %97 = arith.subf %91, %96 : vector<8x32xf32>
    %98 = arith.mulf %97, %97 : vector<8x32xf32>
    %cst_53 = arith.constant dense<0.000000e+00> : vector<8xf32>
    %99 = vector.multi_reduction <add>, %98, %cst_53 [1] : vector<8x32xf32> to vector<8xf32>
    %100 = vector.shape_cast %99 : vector<8xf32> to vector<8x1xf32>
    %cst_54 = arith.constant 3.200000e+01 : f32
    %101 = vector.broadcast %cst_54 : f32 to vector<8x1xf32>
    %102 = arith.divf %100, %101 : vector<8x1xf32>
    %cst_55 = arith.constant 9.99999974E-6 : f32
    %103 = vector.broadcast %cst_55 : f32 to vector<8x1xf32>
    %104 = arith.addf %102, %103 : vector<8x1xf32>
    %105 = math.rsqrt %104 : vector<8x1xf32>
    %106 = vector.broadcast %105 : vector<8x1xf32> to vector<8x32xf32>
    %107 = arith.mulf %97, %106 : vector<8x32xf32>
    %c0_56 = arith.constant 0 : index
    %c0_57 = arith.constant 0 : index
    %c0_58 = arith.constant 0 : index
    %108 = vector.load %arg12[%c0_56, %c0_57, %c0_58] : memref<2x32x64xf32, #tpu.memory_space<vmem>>, vector<1x32x64xf32>
    %109 = vector.shape_cast %108 : vector<1x32x64xf32> to vector<32x64xf32>
    %cst_59 = arith.constant dense<0.000000e+00> : vector<8x64xf32>
    %110 = tpu.matmul %107, %109, %cst_59 {dimension_numbers = #tpu.dot_dimension_numbers<[1], [0], [0], [1], [0, 0, 1, 1], [], []>} : vector<8x32xf32>, vector<32x64xf32>, vector<8x64xf32> -> vector<8x64xf32>
    %cst_60 = arith.constant 0.000000e+00 : f32
    %111 = vector.broadcast %cst_60 : f32 to vector<8x64xf32>
    %112 = arith.maximumf %110, %111 : vector<8x64xf32>
    %c0_61 = arith.constant 0 : index
    %c0_62 = arith.constant 0 : index
    %c0_63 = arith.constant 0 : index
    %113 = vector.load %arg13[%c0_61, %c0_62, %c0_63] : memref<2x64x32xf32, #tpu.memory_space<vmem>>, vector<1x64x32xf32>
    %114 = vector.shape_cast %113 : vector<1x64x32xf32> to vector<64x32xf32>
    %cst_64 = arith.constant dense<0.000000e+00> : vector<8x32xf32>
    %115 = tpu.matmul %112, %114, %cst_64 {dimension_numbers = #tpu.dot_dimension_numbers<[1], [0], [0], [1], [0, 0, 1, 1], [], []>} : vector<8x64xf32>, vector<64x32xf32>, vector<8x32xf32> -> vector<8x32xf32>
    %116 = arith.addf %115, %107 : vector<8x32xf32>
    %cst_65 = arith.constant dense<0.000000e+00> : vector<8xf32>
    %117 = vector.multi_reduction <add>, %116, %cst_65 [1] : vector<8x32xf32> to vector<8xf32>
    %118 = vector.shape_cast %117 : vector<8xf32> to vector<8x1xf32>
    %cst_66 = arith.constant 3.200000e+01 : f32
    %119 = vector.broadcast %cst_66 : f32 to vector<8x1xf32>
    %120 = arith.divf %118, %119 : vector<8x1xf32>
    %121 = vector.broadcast %120 : vector<8x1xf32> to vector<8x32xf32>
    %122 = arith.subf %116, %121 : vector<8x32xf32>
    %123 = arith.mulf %122, %122 : vector<8x32xf32>
    %cst_67 = arith.constant dense<0.000000e+00> : vector<8xf32>
    %124 = vector.multi_reduction <add>, %123, %cst_67 [1] : vector<8x32xf32> to vector<8xf32>
    %125 = vector.shape_cast %124 : vector<8xf32> to vector<8x1xf32>
    %cst_68 = arith.constant 3.200000e+01 : f32
    %126 = vector.broadcast %cst_68 : f32 to vector<8x1xf32>
    %127 = arith.divf %125, %126 : vector<8x1xf32>
    %cst_69 = arith.constant 9.99999974E-6 : f32
    %128 = vector.broadcast %cst_69 : f32 to vector<8x1xf32>
    %129 = arith.addf %127, %128 : vector<8x1xf32>
    %130 = math.rsqrt %129 : vector<8x1xf32>
    %131 = vector.broadcast %130 : vector<8x1xf32> to vector<8x32xf32>
    %132 = arith.mulf %122, %131 : vector<8x32xf32>
    %c1 = arith.constant 1 : index
    %c0_70 = arith.constant 0 : index
    %c0_71 = arith.constant 0 : index
    %133 = vector.load %arg8[%c1, %c0_70, %c0_71] : memref<2x32x32xf32, #tpu.memory_space<vmem>>, vector<1x32x32xf32>
    %134 = vector.shape_cast %133 : vector<1x32x32xf32> to vector<32x32xf32>
    %cst_72 = arith.constant dense<0.000000e+00> : vector<8x32xf32>
    %135 = tpu.matmul %132, %134, %cst_72 {dimension_numbers = #tpu.dot_dimension_numbers<[1], [0], [0], [1], [0, 0, 1, 1], [], []>} : vector<8x32xf32>, vector<32x32xf32>, vector<8x32xf32> -> vector<8x32xf32>
    %c1_73 = arith.constant 1 : index
    %c0_74 = arith.constant 0 : index
    %c0_75 = arith.constant 0 : index
    %136 = vector.load %arg9[%c1_73, %c0_74, %c0_75] : memref<2x32x32xf32, #tpu.memory_space<vmem>>, vector<1x32x32xf32>
    %137 = vector.shape_cast %136 : vector<1x32x32xf32> to vector<32x32xf32>
    %cst_76 = arith.constant dense<0.000000e+00> : vector<8x32xf32>
    %138 = tpu.matmul %132, %137, %cst_76 {dimension_numbers = #tpu.dot_dimension_numbers<[1], [0], [0], [1], [0, 0, 1, 1], [], []>} : vector<8x32xf32>, vector<32x32xf32>, vector<8x32xf32> -> vector<8x32xf32>
    %c1_77 = arith.constant 1 : index
    %c0_78 = arith.constant 0 : index
    %c0_79 = arith.constant 0 : index
    %139 = vector.load %arg10[%c1_77, %c0_78, %c0_79] : memref<2x32x32xf32, #tpu.memory_space<vmem>>, vector<1x32x32xf32>
    %140 = vector.shape_cast %139 : vector<1x32x32xf32> to vector<32x32xf32>
    %cst_80 = arith.constant dense<0.000000e+00> : vector<8x32xf32>
    %141 = tpu.matmul %132, %140, %cst_80 {dimension_numbers = #tpu.dot_dimension_numbers<[1], [0], [0], [1], [0, 0, 1, 1], [], []>} : vector<8x32xf32>, vector<32x32xf32>, vector<8x32xf32> -> vector<8x32xf32>
    %142 = vector.extract_strided_slice %135 {offsets = [0, 0], sizes = [8, 8], strides = [1, 1]} : vector<8x32xf32> to vector<8x8xf32>
    %143 = vector.extract_strided_slice %138 {offsets = [0, 0], sizes = [8, 8], strides = [1, 1]} : vector<8x32xf32> to vector<8x8xf32>
    %144 = tpu.transpose %143, [1, 0] : vector<8x8xf32> -> vector<8x8xf32>
    %cst_81 = arith.constant dense<0.000000e+00> : vector<8x8xf32>
    %145 = tpu.matmul %142, %144, %cst_81 {dimension_numbers = #tpu.dot_dimension_numbers<[1], [0], [0], [1], [0, 0, 1, 1], [], []>} : vector<8x8xf32>, vector<8x8xf32>, vector<8x8xf32> -> vector<8x8xf32>
    %146 = vector.extract_strided_slice %135 {offsets = [0, 8], sizes = [8, 8], strides = [1, 1]} : vector<8x32xf32> to vector<8x8xf32>
    %147 = vector.extract_strided_slice %138 {offsets = [0, 8], sizes = [8, 8], strides = [1, 1]} : vector<8x32xf32> to vector<8x8xf32>
    %148 = tpu.transpose %147, [1, 0] : vector<8x8xf32> -> vector<8x8xf32>
    %cst_82 = arith.constant dense<0.000000e+00> : vector<8x8xf32>
    %149 = tpu.matmul %146, %148, %cst_82 {dimension_numbers = #tpu.dot_dimension_numbers<[1], [0], [0], [1], [0, 0, 1, 1], [], []>} : vector<8x8xf32>, vector<8x8xf32>, vector<8x8xf32> -> vector<8x8xf32>
    %150 = vector.extract_strided_slice %135 {offsets = [0, 16], sizes = [8, 8], strides = [1, 1]} : vector<8x32xf32> to vector<8x8xf32>
    %151 = vector.extract_strided_slice %138 {offsets = [0, 16], sizes = [8, 8], strides = [1, 1]} : vector<8x32xf32> to vector<8x8xf32>
    %152 = tpu.transpose %151, [1, 0] : vector<8x8xf32> -> vector<8x8xf32>
    %cst_83 = arith.constant dense<0.000000e+00> : vector<8x8xf32>
    %153 = tpu.matmul %150, %152, %cst_83 {dimension_numbers = #tpu.dot_dimension_numbers<[1], [0], [0], [1], [0, 0, 1, 1], [], []>} : vector<8x8xf32>, vector<8x8xf32>, vector<8x8xf32> -> vector<8x8xf32>
    %154 = vector.extract_strided_slice %135 {offsets = [0, 24], sizes = [8, 8], strides = [1, 1]} : vector<8x32xf32> to vector<8x8xf32>
    %155 = vector.extract_strided_slice %138 {offsets = [0, 24], sizes = [8, 8], strides = [1, 1]} : vector<8x32xf32> to vector<8x8xf32>
    %156 = tpu.transpose %155, [1, 0] : vector<8x8xf32> -> vector<8x8xf32>
    %cst_84 = arith.constant dense<0.000000e+00> : vector<8x8xf32>
    %157 = tpu.matmul %154, %156, %cst_84 {dimension_numbers = #tpu.dot_dimension_numbers<[1], [0], [0], [1], [0, 0, 1, 1], [], []>} : vector<8x8xf32>, vector<8x8xf32>, vector<8x8xf32> -> vector<8x8xf32>
    %158 = vector.shape_cast %145 : vector<8x8xf32> to vector<1x8x8xf32>
    %159 = vector.shape_cast %149 : vector<8x8xf32> to vector<1x8x8xf32>
    %160 = vector.shape_cast %153 : vector<8x8xf32> to vector<1x8x8xf32>
    %161 = vector.shape_cast %157 : vector<8x8xf32> to vector<1x8x8xf32>
    %162 = tpu.concatenate %158, %159, %160, %161 in 0 : vector<1x8x8xf32>, vector<1x8x8xf32>, vector<1x8x8xf32>, vector<1x8x8xf32> -> vector<4x8x8xf32>
    %cst_85 = arith.constant 0.353553385 : f32
    %163 = vector.broadcast %cst_85 : f32 to vector<4x8x8xf32>
    %164 = arith.mulf %162, %163 : vector<4x8x8xf32>
    %cst_86 = arith.constant -1.000000e+09 : f32
    %165 = vector.shape_cast %21 : vector<1x8xi1> to vector<1x1x8xi1>
    %166 = vector.broadcast %165 : vector<1x1x8xi1> to vector<4x8x8xi1>
    %167 = vector.broadcast %cst_86 : f32 to vector<4x8x8xf32>
    %168 = arith.select %166, %167, %164 : vector<4x8x8xi1>, vector<4x8x8xf32>
    %cst_87 = arith.constant dense<0xFF800000> : vector<4x8xf32>
    %169 = vector.multi_reduction <maximumf>, %168, %cst_87 [2] : vector<4x8x8xf32> to vector<4x8xf32>
    %170 = vector.shape_cast %169 : vector<4x8xf32> to vector<4x8x1xf32>
    %171 = vector.broadcast %170 : vector<4x8x1xf32> to vector<4x8x8xf32>
    %172 = arith.subf %168, %171 : vector<4x8x8xf32>
    %173 = math.exp %172 : vector<4x8x8xf32>
    %cst_88 = arith.constant dense<0.000000e+00> : vector<4x8xf32>
    %174 = vector.multi_reduction <add>, %173, %cst_88 [2] : vector<4x8x8xf32> to vector<4x8xf32>
    %175 = vector.shape_cast %174 : vector<4x8xf32> to vector<4x8x1xf32>
    %176 = tpu.reciprocal %175 {approx = true} : vector<4x8x1xf32> -> vector<4x8x1xf32>
    %177 = vector.broadcast %176 : vector<4x8x1xf32> to vector<4x8x8xf32>
    %178 = arith.mulf %173, %177 : vector<4x8x8xf32>
    %c0_89 = arith.constant 0 : index
    %c0_90 = arith.constant 0 : index
    %c0_91 = arith.constant 0 : index
    %c0_92 = arith.constant 0 : index
    %179 = vector.load %arg20[%c0_89, %c0_90, %c0_91, %c0_92] : memref<1x4x8x8xf32, #tpu.memory_space<vmem>>, vector<1x4x8x8xf32>
    %180 = vector.shape_cast %179 : vector<1x4x8x8xf32> to vector<4x8x8xf32>
    %181 = vector.shape_cast %178 : vector<4x8x8xf32> to vector<1x4x8x8xf32>
    tpu.vector_store %arg20[%c0_89, %c0_90, %c0_91, %c0_92], %181 {strides = array<i32>} : memref<1x4x8x8xf32, #tpu.memory_space<vmem>>, vector<1x4x8x8xf32>,
    %182 = vector.extract_strided_slice %178 {offsets = [0, 0, 0], sizes = [1, 8, 8], strides = [1, 1, 1]} : vector<4x8x8xf32> to vector<1x8x8xf32>
    %183 = vector.shape_cast %182 : vector<1x8x8xf32> to vector<8x8xf32>
    %184 = vector.extract_strided_slice %141 {offsets = [0, 0], sizes = [8, 8], strides = [1, 1]} : vector<8x32xf32> to vector<8x8xf32>
    %cst_93 = arith.constant dense<0.000000e+00> : vector<8x8xf32>
    %185 = tpu.matmul %183, %184, %cst_93 {dimension_numbers = #tpu.dot_dimension_numbers<[1], [0], [0], [1], [0, 0, 1, 1], [], []>} : vector<8x8xf32>, vector<8x8xf32>, vector<8x8xf32> -> vector<8x8xf32>
    %186 = vector.extract_strided_slice %178 {offsets = [1, 0, 0], sizes = [1, 8, 8], strides = [1, 1, 1]} : vector<4x8x8xf32> to vector<1x8x8xf32>
    %187 = vector.shape_cast %186 : vector<1x8x8xf32> to vector<8x8xf32>
    %188 = vector.extract_strided_slice %141 {offsets = [0, 8], sizes = [8, 8], strides = [1, 1]} : vector<8x32xf32> to vector<8x8xf32>
    %cst_94 = arith.constant dense<0.000000e+00> : vector<8x8xf32>
    %189 = tpu.matmul %187, %188, %cst_94 {dimension_numbers = #tpu.dot_dimension_numbers<[1], [0], [0], [1], [0, 0, 1, 1], [], []>} : vector<8x8xf32>, vector<8x8xf32>, vector<8x8xf32> -> vector<8x8xf32>
    %190 = vector.extract_strided_slice %178 {offsets = [2, 0, 0], sizes = [1, 8, 8], strides = [1, 1, 1]} : vector<4x8x8xf32> to vector<1x8x8xf32>
    %191 = vector.shape_cast %190 : vector<1x8x8xf32> to vector<8x8xf32>
    %192 = vector.extract_strided_slice %141 {offsets = [0, 16], sizes = [8, 8], strides = [1, 1]} : vector<8x32xf32> to vector<8x8xf32>
    %cst_95 = arith.constant dense<0.000000e+00> : vector<8x8xf32>
    %193 = tpu.matmul %191, %192, %cst_95 {dimension_numbers = #tpu.dot_dimension_numbers<[1], [0], [0], [1], [0, 0, 1, 1], [], []>} : vector<8x8xf32>, vector<8x8xf32>, vector<8x8xf32> -> vector<8x8xf32>
    %194 = vector.extract_strided_slice %178 {offsets = [3, 0, 0], sizes = [1, 8, 8], strides = [1, 1, 1]} : vector<4x8x8xf32> to vector<1x8x8xf32>
    %195 = vector.shape_cast %194 : vector<1x8x8xf32> to vector<8x8xf32>
    %196 = vector.extract_strided_slice %141 {offsets = [0, 24], sizes = [8, 8], strides = [1, 1]} : vector<8x32xf32> to vector<8x8xf32>
    %cst_96 = arith.constant dense<0.000000e+00> : vector<8x8xf32>
    %197 = tpu.matmul %195, %196, %cst_96 {dimension_numbers = #tpu.dot_dimension_numbers<[1], [0], [0], [1], [0, 0, 1, 1], [], []>} : vector<8x8xf32>, vector<8x8xf32>, vector<8x8xf32> -> vector<8x8xf32>
    %198 = tpu.concatenate %185, %189, %193, %197 in 1 : vector<8x8xf32>, vector<8x8xf32>, vector<8x8xf32>, vector<8x8xf32> -> vector<8x32xf32>
    %c1_97 = arith.constant 1 : index
    %c0_98 = arith.constant 0 : index
    %c0_99 = arith.constant 0 : index
    %199 = vector.load %arg11[%c1_97, %c0_98, %c0_99] : memref<2x32x32xf32, #tpu.memory_space<vmem>>, vector<1x32x32xf32>
    %200 = vector.shape_cast %199 : vector<1x32x32xf32> to vector<32x32xf32>
    %cst_100 = arith.constant dense<0.000000e+00> : vector<8x32xf32>
    %201 = tpu.matmul %198, %200, %cst_100 {dimension_numbers = #tpu.dot_dimension_numbers<[1], [0], [0], [1], [0, 0, 1, 1], [], []>} : vector<8x32xf32>, vector<32x32xf32>, vector<8x32xf32> -> vector<8x32xf32>
    %202 = arith.addf %201, %132 : vector<8x32xf32>
    %cst_101 = arith.constant dense<0.000000e+00> : vector<8xf32>
    %203 = vector.multi_reduction <add>, %202, %cst_101 [1] : vector<8x32xf32> to vector<8xf32>
    %204 = vector.shape_cast %203 : vector<8xf32> to vector<8x1xf32>
    %cst_102 = arith.constant 3.200000e+01 : f32
    %205 = vector.broadcast %cst_102 : f32 to vector<8x1xf32>
    %206 = arith.divf %204, %205 : vector<8x1xf32>
    %207 = vector.broadcast %206 : vector<8x1xf32> to vector<8x32xf32>
    %208 = arith.subf %202, %207 : vector<8x32xf32>
    %209 = arith.mulf %208, %208 : vector<8x32xf32>
    %cst_103 = arith.constant dense<0.000000e+00> : vector<8xf32>
    %210 = vector.multi_reduction <add>, %209, %cst_103 [1] : vector<8x32xf32> to vector<8xf32>
    %211 = vector.shape_cast %210 : vector<8xf32> to vector<8x1xf32>
    %cst_104 = arith.constant 3.200000e+01 : f32
    %212 = vector.broadcast %cst_104 : f32 to vector<8x1xf32>
    %213 = arith.divf %211, %212 : vector<8x1xf32>
    %cst_105 = arith.constant 9.99999974E-6 : f32
    %214 = vector.broadcast %cst_105 : f32 to vector<8x1xf32>
    %215 = arith.addf %213, %214 : vector<8x1xf32>
    %216 = math.rsqrt %215 : vector<8x1xf32>
    %217 = vector.broadcast %216 : vector<8x1xf32> to vector<8x32xf32>
    %218 = arith.mulf %208, %217 : vector<8x32xf32>
    %c1_106 = arith.constant 1 : index
    %c0_107 = arith.constant 0 : index
    %c0_108 = arith.constant 0 : index
    %219 = vector.load %arg12[%c1_106, %c0_107, %c0_108] : memref<2x32x64xf32, #tpu.memory_space<vmem>>, vector<1x32x64xf32>
    %220 = vector.shape_cast %219 : vector<1x32x64xf32> to vector<32x64xf32>
    %cst_109 = arith.constant dense<0.000000e+00> : vector<8x64xf32>
    %221 = tpu.matmul %218, %220, %cst_109 {dimension_numbers = #tpu.dot_dimension_numbers<[1], [0], [0], [1], [0, 0, 1, 1], [], []>} : vector<8x32xf32>, vector<32x64xf32>, vector<8x64xf32> -> vector<8x64xf32>
    %cst_110 = arith.constant 0.000000e+00 : f32
    %222 = vector.broadcast %cst_110 : f32 to vector<8x64xf32>
    %223 = arith.maximumf %221, %222 : vector<8x64xf32>
    %c1_111 = arith.constant 1 : index
    %c0_112 = arith.constant 0 : index
    %c0_113 = arith.constant 0 : index
    %224 = vector.load %arg13[%c1_111, %c0_112, %c0_113] : memref<2x64x32xf32, #tpu.memory_space<vmem>>, vector<1x64x32xf32>
    %225 = vector.shape_cast %224 : vector<1x64x32xf32> to vector<64x32xf32>
    %cst_114 = arith.constant dense<0.000000e+00> : vector<8x32xf32>
    %226 = tpu.matmul %223, %225, %cst_114 {dimension_numbers = #tpu.dot_dimension_numbers<[1], [0], [0], [1], [0, 0, 1, 1], [], []>} : vector<8x64xf32>, vector<64x32xf32>, vector<8x32xf32> -> vector<8x32xf32>
    %227 = arith.addf %226, %218 : vector<8x32xf32>
    %cst_115 = arith.constant dense<0.000000e+00> : vector<8xf32>
    %228 = vector.multi_reduction <add>, %227, %cst_115 [1] : vector<8x32xf32> to vector<8xf32>
    %229 = vector.shape_cast %228 : vector<8xf32> to vector<8x1xf32>
    %cst_116 = arith.constant 3.200000e+01 : f32
    %230 = vector.broadcast %cst_116 : f32 to vector<8x1xf32>
    %231 = arith.divf %229, %230 : vector<8x1xf32>
    %232 = vector.broadcast %231 : vector<8x1xf32> to vector<8x32xf32>
    %233 = arith.subf %227, %232 : vector<8x32xf32>
    %234 = arith.mulf %233, %233 : vector<8x32xf32>
    %cst_117 = arith.constant dense<0.000000e+00> : vector<8xf32>
    %235 = vector.multi_reduction <add>, %234, %cst_117 [1] : vector<8x32xf32> to vector<8xf32>
    %236 = vector.shape_cast %235 : vector<8xf32> to vector<8x1xf32>
    %cst_118 = arith.constant 3.200000e+01 : f32
    %237 = vector.broadcast %cst_118 : f32 to vector<8x1xf32>
    %238 = arith.divf %236, %237 : vector<8x1xf32>
    %cst_119 = arith.constant 9.99999974E-6 : f32
    %239 = vector.broadcast %cst_119 : f32 to vector<8x1xf32>
    %240 = arith.addf %238, %239 : vector<8x1xf32>
    %241 = math.rsqrt %240 : vector<8x1xf32>
    %242 = vector.broadcast %241 : vector<8x1xf32> to vector<8x32xf32>
    %243 = arith.mulf %233, %242 : vector<8x32xf32>
    %c0_120 = arith.constant 0 : index
    %c0_121 = arith.constant 0 : index
    %244 = vector.load %arg14[%c0_120, %c0_121] : memref<32x16xf32, #tpu.memory_space<vmem>>, vector<32x16xf32>
    %cst_122 = arith.constant dense<0.000000e+00> : vector<8x16xf32>
    %245 = tpu.matmul %243, %244, %cst_122 {dimension_numbers = #tpu.dot_dimension_numbers<[1], [0], [0], [1], [0, 0, 1, 1], [], []>} : vector<8x32xf32>, vector<32x16xf32>, vector<8x16xf32> -> vector<8x16xf32>
    %c0_123 = arith.constant 0 : index
    %c0_124 = arith.constant 0 : index
    %246 = vector.load %arg15[%c0_123, %c0_124] : memref<1x16xf32, #tpu.memory_space<vmem>>, vector<1x16xf32>
    %247 = vector.broadcast %246 : vector<1x16xf32> to vector<8x16xf32>
    %248 = arith.addf %245, %247 : vector<8x16xf32>
    %cst_125 = arith.constant 0.000000e+00 : f32
    %249 = vector.broadcast %cst_125 : f32 to vector<8x16xf32>
    %250 = arith.maximumf %248, %249 : vector<8x16xf32>
    %c0_126 = arith.constant 0 : index
    %c0_127 = arith.constant 0 : index
    %251 = vector.load %arg16[%c0_126, %c0_127] : memref<1x16xf32, #tpu.memory_space<vmem>>, vector<1x16xf32>
    %252 = vector.broadcast %251 : vector<1x16xf32> to vector<8x16xf32>
    %253 = arith.mulf %250, %252 : vector<8x16xf32>
    %cst_128 = arith.constant dense<0.000000e+00> : vector<8xf32>
    %254 = vector.multi_reduction <add>, %253, %cst_128 [1] : vector<8x16xf32> to vector<8xf32>
    %255 = vector.shape_cast %254 : vector<8xf32> to vector<1x8xf32>
    %c0_129 = arith.constant 0 : index
    %c0_130 = arith.constant 0 : index
    %256 = vector.load %arg17[%c0_129, %c0_130] : memref<1x1xf32, #tpu.memory_space<vmem>>, vector<1x1xf32>
    %257 = vector.broadcast %256 : vector<1x1xf32> to vector<1x8xf32>
    %258 = arith.addf %255, %257 : vector<1x8xf32>
    %c0_131 = arith.constant 0 : index
    %c0_132 = arith.constant 0 : index
    %c0_133 = arith.constant 0 : index
    %259 = vector.load %arg18[%c0_131, %c0_132, %c0_133] : memref<1x1x8xf32, #tpu.memory_space<vmem>>, vector<1x1x8xf32>
    %260 = vector.shape_cast %259 : vector<1x1x8xf32> to vector<1x8xf32>
    %261 = vector.shape_cast %258 : vector<1x8xf32> to vector<1x1x8xf32>
    tpu.vector_store %arg18[%c0_131, %c0_132, %c0_133], %261 {strides = array<i32>} : memref<1x1x8xf32, #tpu.memory_space<vmem>>, vector<1x1x8xf32>,
    return
  }
  func.func @transform_0(%arg0: i32) -> (i32, i32, i32) {
    %c0_i32 = arith.constant 0 : i32
    %c0_i32_0 = arith.constant 0 : i32
    %c0_i32_1 = arith.constant 0 : i32
    return %arg0, %c0_i32, %c0_i32_0 : i32, i32, i32
  }
  func.func @transform_1(%arg0: i32) -> (i32, i32, i32) {
    %c0_i32 = arith.constant 0 : i32
    %c0_i32_0 = arith.constant 0 : i32
    %c0_i32_1 = arith.constant 0 : i32
    return %arg0, %c0_i32, %c0_i32_0 : i32, i32, i32
  }
  func.func @transform_2(%arg0: i32) -> (i32, i32) {
    %c0_i32 = arith.constant 0 : i32
    %c0_i32_0 = arith.constant 0 : i32
    %c0_i32_1 = arith.constant 0 : i32
    return %c0_i32, %c0_i32_0 : i32, i32
  }
  func.func @transform_3(%arg0: i32) -> (i32, i32) {
    %c0_i32 = arith.constant 0 : i32
    %c0_i32_0 = arith.constant 0 : i32
    %c0_i32_1 = arith.constant 0 : i32
    return %c0_i32, %c0_i32_0 : i32, i32
  }
  func.func @transform_4(%arg0: i32) -> (i32, i32) {
    %c0_i32 = arith.constant 0 : i32
    %c0_i32_0 = arith.constant 0 : i32
    %c0_i32_1 = arith.constant 0 : i32
    return %c0_i32, %c0_i32_0 : i32, i32
  }
  func.func @transform_5(%arg0: i32) -> (i32, i32) {
    %c0_i32 = arith.constant 0 : i32
    %c0_i32_0 = arith.constant 0 : i32
    %c0_i32_1 = arith.constant 0 : i32
    return %c0_i32, %c0_i32_0 : i32, i32
  }
  func.func @transform_6(%arg0: i32) -> (i32, i32) {
    %c0_i32 = arith.constant 0 : i32
    %c0_i32_0 = arith.constant 0 : i32
    %c0_i32_1 = arith.constant 0 : i32
    return %c0_i32, %c0_i32_0 : i32, i32
  }
  func.func @transform_7(%arg0: i32) -> (i32, i32, i32) {
    %c0_i32 = arith.constant 0 : i32
    %c0_i32_0 = arith.constant 0 : i32
    %c0_i32_1 = arith.constant 0 : i32
    %c0_i32_2 = arith.constant 0 : i32
    return %c0_i32, %c0_i32_0, %c0_i32_1 : i32, i32, i32
  }
  func.func @transform_8(%arg0: i32) -> (i32, i32, i32) {
    %c0_i32 = arith.constant 0 : i32
    %c0_i32_0 = arith.constant 0 : i32
    %c0_i32_1 = arith.constant 0 : i32
    %c0_i32_2 = arith.constant 0 : i32
    return %c0_i32, %c0_i32_0, %c0_i32_1 : i32, i32, i32
  }
  func.func @transform_9(%arg0: i32) -> (i32, i32, i32) {
    %c0_i32 = arith.constant 0 : i32
    %c0_i32_0 = arith.constant 0 : i32
    %c0_i32_1 = arith.constant 0 : i32
    %c0_i32_2 = arith.constant 0 : i32
    return %c0_i32, %c0_i32_0, %c0_i32_1 : i32, i32, i32
  }
  func.func @transform_10(%arg0: i32) -> (i32, i32, i32) {
    %c0_i32 = arith.constant 0 : i32
    %c0_i32_0 = arith.constant 0 : i32
    %c0_i32_1 = arith.constant 0 : i32
    %c0_i32_2 = arith.constant 0 : i32
    return %c0_i32, %c0_i32_0, %c0_i32_1 : i32, i32, i32
  }
  func.func @transform_11(%arg0: i32) -> (i32, i32, i32) {
    %c0_i32 = arith.constant 0 : i32
    %c0_i32_0 = arith.constant 0 : i32
    %c0_i32_1 = arith.constant 0 : i32
    %c0_i32_2 = arith.constant 0 : i32
    return %c0_i32, %c0_i32_0, %c0_i32_1 : i32, i32, i32
  }
  func.func @transform_12(%arg0: i32) -> (i32, i32, i32) {
    %c0_i32 = arith.constant 0 : i32
    %c0_i32_0 = arith.constant 0 : i32
    %c0_i32_1 = arith.constant 0 : i32
    %c0_i32_2 = arith.constant 0 : i32
    return %c0_i32, %c0_i32_0, %c0_i32_1 : i32, i32, i32
  }
  func.func @transform_13(%arg0: i32) -> (i32, i32) {
    %c0_i32 = arith.constant 0 : i32
    %c0_i32_0 = arith.constant 0 : i32
    %c0_i32_1 = arith.constant 0 : i32
    return %c0_i32, %c0_i32_0 : i32, i32
  }
  func.func @transform_14(%arg0: i32) -> (i32, i32) {
    %c0_i32 = arith.constant 0 : i32
    %c0_i32_0 = arith.constant 0 : i32
    %c0_i32_1 = arith.constant 0 : i32
    return %c0_i32, %c0_i32_0 : i32, i32
  }
  func.func @transform_15(%arg0: i32) -> (i32, i32) {
    %c0_i32 = arith.constant 0 : i32
    %c0_i32_0 = arith.constant 0 : i32
    %c0_i32_1 = arith.constant 0 : i32
    return %c0_i32, %c0_i32_0 : i32, i32
  }
  func.func @transform_16(%arg0: i32) -> (i32, i32) {
    %c0_i32 = arith.constant 0 : i32
    %c0_i32_0 = arith.constant 0 : i32
    %c0_i32_1 = arith.constant 0 : i32
    return %c0_i32, %c0_i32_0 : i32, i32
  }
  func.func @transform_17(%arg0: i32) -> (i32, i32, i32) {
    %c0_i32 = arith.constant 0 : i32
    %c0_i32_0 = arith.constant 0 : i32
    %c0_i32_1 = arith.constant 0 : i32
    return %arg0, %c0_i32, %c0_i32_0 : i32, i32, i32
  }
  func.func @transform_18(%arg0: i32) -> (i32, i32, i32, i32) {
    %c0_i32 = arith.constant 0 : i32
    %c0_i32_0 = arith.constant 0 : i32
    %c0_i32_1 = arith.constant 0 : i32
    %c0_i32_2 = arith.constant 0 : i32
    return %arg0, %c0_i32, %c0_i32_0, %c0_i32_1 : i32, i32, i32, i32
  }
  func.func @transform_19(%arg0: i32) -> (i32, i32, i32, i32) {
    %c0_i32 = arith.constant 0 : i32
    %c0_i32_0 = arith.constant 0 : i32
    %c0_i32_1 = arith.constant 0 : i32
    %c0_i32_2 = arith.constant 0 : i32
    return %arg0, %c0_i32, %c0_i32_0, %c0_i32_1 : i32, i32, i32, i32
  }
}

</mosaic_0001>

<bundles_post_ra>
// kernel: encoder_forward.1
= control target key start
LH: loop header
LB: loop body
LE: loop exit
PB: predicated region body
PF: predicated region fallthrough
CT: control target
= control target key end

     0   :  { %s5372_s0 = inlined_call_operand.vmem [shape: f32[2,8,8], index: 0, kind: input, shape index: {}]   ;;  %s5373_s1 = inlined_call_operand.vmem [shape: f32[2,1,8], index: 1, kind: input, shape index: {}]   ;;  %s5374_s2 = inlined_call_operand.vmem [shape: f32[8,32], index: 2, kind: input, shape index: {}]   ;;  %s5375_s3 = inlined_call_operand.hbm [shape: f32[8,32], index: 3, kind: input, shape index: {}]   ;;  %s5376_s4 = inlined_call_operand.vmem [shape: f32[1,32], index: 4, kind: input, shape index: {}]   ;;  %s5377_s5 = inlined_call_operand.hbm [shape: f32[32,32], index: 5, kind: input, shape index: {}]   ;;  %s5378_s6 = inlined_call_operand.vmem [shape: f32[1,32], index: 6, kind: input, shape index: {}]   ;;  %s5379_s7 = inlined_call_operand.vmem [shape: f32[2,32,32], index: 7, kind: input, shape index: {}]   ;;  %s5380_s8 = inlined_call_operand.vmem [shape: f32[2,32,32], index: 8, kind: input, shape index: {}]   ;;  %s5381_s9 = inlined_call_operand.vmem [shape: f32[2,32,32], index: 9, kind: input, shape index: {}]   ;;  %s5382_s10 = inlined_call_operand.hbm [shape: f32[2,32,32], index: 10, kind: input, shape index: {}]   ;;  %s5383_s11 = inlined_call_operand.hbm [shape: f32[2,32,64], index: 11, kind: input, shape index: {}]   ;;  %s5384_s12 = inlined_call_operand.vmem [shape: f32[2,64,32], index: 12, kind: input, shape index: {}]   ;;  %s5385_s13 = inlined_call_operand.vmem [shape: f32[32,16], index: 13, kind: input, shape index: {}]   ;;  %s5386_s14 = inlined_call_operand.vmem [shape: f32[1,16], index: 14, kind: input, shape index: {}]   ;;  %s5387_s15 = inlined_call_operand.vmem [shape: f32[1,16], index: 15, kind: input, shape index: {}]   ;;  %s5388_s16 = inlined_call_operand.<no memory space> [shape: f32[1,1], index: 16, kind: input, shape index: {}]   ;;  %s5389_s17 = inlined_call_operand.hbm [shape: f32[2,1,8], index: 17, kind: output, shape index: {0}]   ;;  %s5390_s18 = inlined_call_operand.hbm [shape: f32[2,4,8,8], index: 18, kind: output, shape index: {1}]   ;;  %s5391_s19 = inlined_call_operand.hbm [shape: f32[2,4,8,8], index: 19, kind: output, shape index: {2}]  }
   0x1   :  { %5413 = sst [smem:[#allocation27_spill]] %s5372_s0  ;;  %v25_v0 = vstv %s5388_s16 }
   0x2   :  { %5414 = sst [smem:[#allocation28_spill]] %s5373_s1  ;;  %26 = vst [vmem:[#allocation2] sm:$0x1] %v25_v0 }
   0x3   :  { %5415 = sst [smem:[#allocation29_spill]] %s5374_s2 }
   0x4   :  { %5416 = sst [smem:[#allocation30_spill]] %s5375_s3 }
   0x5   :  { %5417 = sst [smem:[#allocation31_spill]] %s5376_s4 }
   0x6   :  { %5418 = sst [smem:[#allocation32_spill]] %s5377_s5 }
   0x7   :  { %5419 = sst [smem:[#allocation33_spill]] %s5387_s15 }
   0x8   :  { %5420 = sst [smem:[#allocation34_spill]] %s5389_s17 }
   0x9   :  { %5421 = sst [smem:[#allocation35_spill]] %s5390_s18 }
   0xa   :  { %5422 = sst [smem:[#allocation36_spill]] %s5391_s19 }
   0xb   :  { %27 = vsyncpa [#allocation4], 0 }
   0xc   :  { %28 = vsyncpa [#allocation7], 0 }
   0xd   :  { %29 = vsyncpa [#allocation10], 0 }
   0xe   :  { %30 = vsyncpa [#allocation5], 0 }
   0xf   :  { %32 = vsyncpa [#allocation5 + $0x1], 0 }
  0x10   :  { %33 = vsyncpa [#allocation13], 0 }
  0x11   :  { %35 = vsyncpa [#allocation13 + $0x1], 0  ;;  %s4623_s20 = smov 0   ;;  %s4625_s21 = smov 0  }
  0x12   :  { %s4627_s1 = smov 0   ;;  %s4629_s22 = smov 0  }
  0x13 LB: > { %5423 = sst [smem:[#allocation20_spill]] %s4486_s20  ;;  %s4644_s16 = sadd.s32 4294967295, %s4498_s22   ;;  %s4498_s22 = sphi %s4629_s22, %s5463_s22   ;;  %s4494_s1 = sphi %s4627_s1, %s5465_s1   ;;  %s4490_s21 = sphi %s4625_s21, %s5467_s21   ;;  %s4486_s20 = sphi %s4623_s20, %s5466_s20  }
  0x14   : > { %5424 = sst [smem:[#allocation21_spill]] %s4494_s1  ;;  %s5393_s2 = sadd.s32 4294967294, %s4498_s22  }
  0x15   : > { %5425 = sst [smem:[#allocation22_spill]] %s4498_s22  ;;  %s4648_s23 = sadd.s32 1, %s4498_s22  }
  0x16   : > { %5426 = sst [smem:[#allocation23_spill]] %s4648_s23  ;;  %s415_s24 = sadd.s32 1, %s4494_s1 }
  0x17   : > { %s412_s25 = ssub.s32 %s4498_s22, %s4648_s23  ;;  %p425_p0 = scmp.ne.s32.totalorder %s4494_s1, %s4490_s21 }
  0x18   : > { %p413_p1 = scmp.eq.s32.totalorder %s412_s25, 0  ;;  %p426_p2 = scmp.eq.s32.totalorder %s4644_s16, 1 }
  0x19   : > { %p431_p3 = scmp.ne.s32.totalorder %s4490_s21, %s4486_s20  ;;  %p432_p4 = scmp.eq.s32.totalorder %s5393_s2, 1 }
  0x1a   : > { %s4661_s3 = scalar_select %p413_p1, %s4494_s1, %s415_s24  }
  0x1b   : > { %p4663_p5 = por %p426_p2, %p425_p0  ;;  %p4667_p6 = por %p432_p4, %p431_p3 }
  0x1c   : > { %5427 = sst [smem:[#allocation24_spill]] %s4661_s3  ;;  %p3557_p7 = scmp.ge.s32.totalorder %s4498_s22, 1 }
  0x1d   : > { %s5428_s26 = scalar_select %p4663_p5, 1, 0 }
  0x1e   : > { %s5430_s27 = scalar_select %p4667_p6, 1, 0 }
  0x1f   : > { %5429 = sst [smem:[#allocation25_spill]] %s5428_s26  ;;  %p491_p8 = scmp.lt.s32.totalorder %s4498_s22, 3 }
  0x20   : > { %5431 = sst [smem:[#allocation26_spill]] %s5430_s27  ;;  %p5401_p9 = scmp.eq.s32.totalorder %s4644_s16, 0 }
  0x21   : > { %p4674_p10 = pnand %p3557_p7, %p491_p8  ;;  %s4500_s29 = smov [#allocation6]  }
  0x22   : > { %s520_s0 = sshll.u32 %s4500_s29, 4  ;;  %s4501_s24 = smov [#allocation3]   ;;  %s4680_s0 = int_to_ptr.vmem [resolvable:$true] %s520_s0 }
  0x23   : > { %s5432_s28 = scalar_select %p4674_p10, 1, 0 }
  0x24   : > { %p4130_p11 = pneg %p4674_p10  ;;  %s507_s25 = sshll.u32 %s4501_s24, 4  ;;  %s4688_s25 = int_to_ptr.vmem [resolvable:$true] %s507_s25 }
  0x25   : > { %s4502_s2 = smov [#allocation8]   ;;  %s5434_s5 = sld [smem:[#allocation32_spill]] }
  0x26   : > { %p4684_p12 = pnand %p5401_p9, %p4130_p11  ;;  %s4690_s3 = sshll.u32 %s4502_s2, 4  ;;  %s546_s3 = int_to_ptr.vmem [resolvable:$true] %s4690_s3 }
  0x28   : > { %p4700_p0 = pneg %p4684_p12 }
  0x2b   : > { %s4252_s29 = scalar_lea.hbm %s5434_s5, 512 }
  0x2c   : > { %p4253_p13 = scmp.ne.s32.totalorder %s5434_s5, %s4252_s29  ;;  %p4259_p3 = scmp.lt.u32.totalorder %s4252_s29, %s5434_s5 }
  0x2e   : > { %p4255_p1 = pnand %p4700_p0, %p4253_p13 }
  0x30   : > { %p4256_p2 = pneg %p4255_p1 }
  0x32   : > { %p4261_p4 = pnand %p4259_p3, %p4256_p2 }
  0x34   : > { %4264 = shalt.err (!%p4261_p4)
}
  0x35   : > { %s4265_s20 = scalar_lea.vmem %s4680_s0, 512  ;;  %p4273_p9 = scmp.lt.s32.totalorder %s4680_s0, %s4680_s0 }
  0x36   : > { %p4266_p7 = scmp.ne.s32.totalorder %s4680_s0, %s4265_s20  ;;  %p4274_p6 = scmp.lt.s32.totalorder %s4265_s20, %s4265_s20 }
  0x38   : > { %p4268_p8 = pnand %p4266_p7, %p4700_p0  ;;  %p4275_p13 = por %p4274_p6, %p4273_p9 }
  0x3a   : > { %p4269_p11 = pneg %p4268_p8 }
  0x3c   : > { %p4276_p1 = pnand %p4275_p13, %p4269_p11 }
  0x3e   : > { %4279 = shalt.err (!%p4276_p1)
}
  0x3f   : > { %s4503_s1 = smov 128   ;;  %s4504_s23 = smov 8  }
  0x40   : > { %4136 = dma.hbm_to_vmem [thread:$0]  (!%p4684_p12), %s5434_s5, 512, %s4680_s0, [#allocation7], %s4503_s1, %s4503_s1, %s4504_s23  }
  0x41   : > { %s5436_s17 = sld [smem:[#allocation30_spill]] }
  0x47   : > { %s4280_s20 = scalar_lea.hbm %s5436_s17, 128 }
  0x48   : > { %p4281_p6 = scmp.ne.s32.totalorder %s5436_s17, %s4280_s20  ;;  %p4287_p3 = scmp.lt.u32.totalorder %s4280_s20, %s5436_s17 }
  0x4a   : > { %p4283_p9 = pnand %p4281_p6, %p4700_p0 }
  0x4c   : > { %p4284_p2 = pneg %p4283_p9 }
  0x4e   : > { %p4289_p4 = pnand %p4287_p3, %p4284_p2 }
  0x50   : > { %4292 = shalt.err (!%p4289_p4)
}
  0x51   : > { %s4293_s0 = scalar_lea.vmem %s4688_s25, 128  ;;  %p4301_p13 = scmp.lt.s32.totalorder %s4688_s25, %s4688_s25 }
  0x52   : > { %p4294_p7 = scmp.ne.s32.totalorder %s4688_s25, %s4293_s0  ;;  %p4302_p1 = scmp.lt.s32.totalorder %s4293_s0, %s4293_s0 }
  0x54   : > { %p4296_p8 = pnand %p4294_p7, %p4700_p0  ;;  %p4303_p6 = por %p4302_p1, %p4301_p13 }
  0x56   : > { %p4297_p11 = pneg %p4296_p8 }
  0x58   : > { %p4304_p9 = pnand %p4303_p6, %p4297_p11 }
  0x5a   : > { %4307 = shalt.err (!%p4304_p9)
}
  0x5b   : > { %4133 = dma.hbm_to_vmem [thread:$0]  (!%p4684_p12), %s5436_s17, 128, %s4688_s25, [#allocation4]  }
  0x5c   : > { %s4308_s27 = scalar_lea.hbm %s5382_s10, 1024 }
  0x5d   : > { %p4309_p2 = scmp.ne.s32.totalorder %s5382_s10, %s4308_s27  ;;  %p4315_p7 = scmp.lt.u32.totalorder %s4308_s27, %s5382_s10 }
  0x5f   : > { %p4311_p3 = pnand %p4309_p2, %p4700_p0 }
  0x61   : > { %p4312_p4 = pneg %p4311_p3 }
  0x63   : > { %p4317_p8 = pnand %p4315_p7, %p4312_p4 }
  0x65   : > { %4320 = shalt.err (!%p4317_p8)
}
  0x66   : > { %s4321_s0 = scalar_lea.vmem %s546_s3, 1024  ;;  %p4329_p6 = scmp.lt.s32.totalorder %s546_s3, %s546_s3 }
  0x67   : > { %p4322_p11 = scmp.ne.s32.totalorder %s546_s3, %s4321_s0  ;;  %p4330_p9 = scmp.lt.s32.totalorder %s4321_s0, %s4321_s0 }
  0x69   : > { %p4324_p13 = pnand %p4322_p11, %p4700_p0  ;;  %p4331_p5 = por %p4330_p9, %p4329_p6 }
  0x6b   : > { %p4325_p1 = pneg %p4324_p13 }
  0x6d   : > { %p4332_p10 = pnand %p4331_p5, %p4325_p1 }
  0x6f   : > { %4335 = shalt.err (!%p4332_p10)
}
  0x70   : > { %4139 = dma.hbm_to_vmem [thread:$0]  (!%p4684_p12), %s5382_s10, 1024, %s546_s3, [#allocation7], %s4503_s1, %s4503_s1, %s4504_s23  }
  0x71   : > { %s4505_s18 = smov [#allocation9]   ;;  %s4336_s29 = scalar_lea.hbm %s5383_s11, 1024 }
  0x72   : > { %s558_s19 = sshll.u32 %s4505_s18, 4  ;;  %p4337_p5 = scmp.ne.s32.totalorder %s5383_s11, %s4336_s29  ;;  %s559_s19 = int_to_ptr.vmem [resolvable:$true] %s558_s19 }
  0x73   : > { %p4343_p3 = scmp.lt.u32.totalorder %s4336_s29, %s5383_s11 }
  0x74   : > { %p4339_p10 = pnand %p4337_p5, %p4700_p0 }
  0x76   : > { %p4340_p2 = pneg %p4339_p10 }
  0x78   : > { %p4345_p4 = pnand %p4343_p3, %p4340_p2 }
  0x7a   : > { %4348 = shalt.err (!%p4345_p4)
}
  0x7b   : > { %s4349_s3 = scalar_lea.vmem %s559_s19, 1024  ;;  %p4357_p13 = scmp.lt.s32.totalorder %s559_s19, %s559_s19 }
  0x7c   : > { %p4350_p7 = scmp.ne.s32.totalorder %s559_s19, %s4349_s3  ;;  %p4358_p1 = scmp.lt.s32.totalorder %s4349_s3, %s4349_s3 }
  0x7e   : > { %p4352_p8 = pnand %p4350_p7, %p4700_p0  ;;  %p4359_p6 = por %p4358_p1, %p4357_p13 }
  0x80   : > { %p4353_p11 = pneg %p4352_p8 }
  0x82   : > { %p4360_p9 = pnand %p4359_p6, %p4353_p11 }
  0x84   : > { %4363 = shalt.err (!%p4360_p9)
}
  0x85   : > { %4142 = dma.hbm_to_vmem [thread:$0]  (!%p4684_p12), %s5383_s11, 1024, %s559_s19, [#allocation10], %s4503_s1, %s4503_s1, %s4504_s23  }
  0x86   : > { %p5437_p5 = scmp.ne.s32.totalorder %s5432_s28, 0 }
  0x87   : > { %p5438_p0 = scmp.eq.s32.totalorder (!%p5437_p5), %s4644_s16, 0 }
  0x88   : > { %602 = sbr.rel (%p5437_p5) target bundleno = 5893 (0x1705), region = 88 }
  0x8f   : > { %4465 = dma.done.wait (%p5438_p0), [#allocation4], 128   ;;  %p5439_p10 = pmov %p5438_p0 }
  0x90   : > { %p5440_p2 = pmov %p5438_p0 }
  0x91   : > { %4467 = vsyncadd (%p5439_p10), [#allocation4], 4294967168 }
  0x92   : > { %4469 = dma.done.wait (%p5440_p2), [#allocation7], 1536   ;;  %p5441_p3 = pmov %p5438_p0 }
  0x93   : > { %p5442_p4 = pmov %p5438_p0 }
  0x94   : > { %4471 = vsyncadd (%p5441_p3), [#allocation7], 4294965760 }
  0x95   : > { %4473 = dma.done.wait (%p5442_p4), [#allocation10], 1024   ;;  %p5443_p12 = pmov %p5438_p0 }
  0x96   : > { %p681_p7 = scmp.lt.s32.totalorder %s4644_s16, 1  ;;  %v4506_v1 = vmov 0.0   ;;  %vm4507_vm0 = vmmov 0   ;;  %v4508_v2 = vmov 0.0|0.0   ;;  %v4509_v3 = vmov 0   ;;  %s5444_s23 = sld [smem:[#allocation28_spill]] }
  0x97   : > { %4475 = vsyncadd (%p5443_p12), [#allocation10], 4294966272  ;;  %3757 = vmatprep.subr.mxu0 %v4506_v1  ;;  %3759 = vmatprep.mubr.msk.f32.mxu0 %vm4507_vm0, %v4506_v1  ;;  %s5445_s27 = sld [smem:[#allocation27_spill]]  ;;  %vm697_vm1 = vcmask 64512   ;;  %v689_v4 = vld [vmem:[#allocation3] sm:$0xff]  ;;  %v772_v7 = vld [vmem:[#allocation6] sm:$0xff]  ;;  %v1402_v56 = vlaneseq }
  0x98   : > { %s682_s22 = scalar_select %p681_p7, %s4644_s16, 1  ;;  %4012 = vmatprep.subr.bf16.mxu1 %v4508_v2  ;;  %3770 = vmatprep.mubr.msk.f32.mxu1 %vm4507_vm0, %v4506_v1  ;;  %v773_v8 = vld [vmem:[#allocation6 + $0x8] sm:$0xff]  ;;  %v774_v11 = vld [vmem:[#allocation6 + $0x10] sm:$0xff]  ;;  %v775_v12 = vld [vmem:[#allocation6 + $0x18] sm:$0xff]  ;;  %vm783_vm3 = vcmask 261120   ;;  %vm1774_vm5 = vcmask 130048  }
  0x99   : > { %4211 = vset.pattern.permute.xlu0 %v4509_v3  ;;  %3758 = vmatpush3.msra.mxu0 %v689_v4  ;;  %v4013_v10 = vpack.c.bf16 %v773_v8, %v772_v7  ;;  %v4016_v13 = vpack.c.bf16 %v775_v12, %v774_v11  ;;  %v862_v14 = vld [vmem:[%s5379_s7] sm:$0xff]  ;;  %v863_v15 = vld [vmem:[%s5379_s7 + $0x8] sm:$0xff]  ;;  %s5446_s4 = sld [smem:[#allocation31_spill]]  ;;  %v864_v25 = vld [vmem:[%s5379_s7 + $0x10] sm:$0xff]  ;;  %s5447_s30 = sld [smem:[#allocation29_spill]]  ;;  %v4925_v57 = vshrl.u32 %v1402_v56, 7 }
  0x9a   : > { %s3570_s28 = sshll.u32 %s682_s22, 3  ;;  %4018 = vmatprep.subr.bf16.mxu0 %v4508_v2  ;;  %v4019_v16 = vpack.c.bf16 %v863_v15, %v862_v14  ;;  %v939_v22 = vld [vmem:[%s5380_s8] sm:$0xff]  ;;  %v940_v23 = vld [vmem:[%s5380_s8 + $0x8] sm:$0xff]  ;;  %v865_v26 = vld [vmem:[%s5379_s7 + $0x18] sm:$0xff]  ;;  %s4510_s26 = smov 112   ;;  %vm1776_vm6 = vcmask 195584  }
  0x9b   : > { %4014 = vmatpush3.bf16.msra.mxu1 %v4013_v10  ;;  %v4025_v24 = vpack.c.bf16 %v940_v23, %v939_v22  ;;  %v4022_v27 = vpack.c.bf16 %v865_v26, %v864_v25  ;;  %v941_v28 = vld [vmem:[%s5380_s8 + $0x10] sm:$0xff]  ;;  %v942_v29 = vld [vmem:[%s5380_s8 + $0x18] sm:$0xff]  ;;  %v3573_v31 = vld [vmem:[%s5378_s6] ss:$0 sm:$0xff]  ;;  %v1404_v58 = vsub.s32 0, %v4925_v57  ;;  %s4958_s24 = sand.u32 1, %s4490_s21  }
  0x9c   : > { %s687_s18 = scalar_lea.vmem %s5444_s23, %s682_s22  ;;  %4015 = vmatprep.subr.bf16.mxu1 %v4508_v2  ;;  %v4028_v30 = vpack.c.bf16 %v942_v29, %v941_v28  ;;  %v1013_v35 = vld [vmem:[%s5381_s9] sm:$0xff]  ;;  %v1014_v36 = vld [vmem:[%s5381_s9 + $0x8] sm:$0xff]  ;;  %v1015_v41 = vld [vmem:[%s5381_s9 + $0x10] sm:$0xff]  ;;  %s3568_s2 = sshll.u32 %s4958_s24, 5  ;;  %vm1955_vm7 = vcmask 523264  }
  0x9d   : > { %s684_s29 = scalar_lea.vmem %s5445_s27, %s3570_s28  ;;  %v860_v6 = vld [vmem:[%s687_s18] sm:$0x1]  ;;  %v4031_v39 = vpack.c.bf16 %v1014_v36, %v1013_v35  ;;  %v1016_v42 = vld [vmem:[%s5381_s9 + $0x18] sm:$0xff]  ;;  %s4511_s27 = smov 120  }
  0x9e   : > { %v688_v5 = vld [vmem:[%s684_s29] sm:$0xff]  ;;  %vm861_vm2 = vcmp.gt.f32.partialorder %v860_v6, 0.5  ;;  %v4034_v43 = vpack.c.bf16 %v1016_v42, %v1015_v41  ;;  %s4512_s29 = smov 104   ;;  %s4963_s20 = scalar_lea.vmem [#allocation12], %s3568_s2 }
  0x9f   : > { %3760 = vmatmul.mubr.msk.f32.vlgmr.msra.gmra.mrb[0].mxu0 %vm697_vm1, %v688_v5  ;;  %v4819_v9 = vsel %vm861_vm2, 1, %v4509_v3  ;;  %4017 = vmatpush3.bf16.msra.mxu1 %v4016_v13  ;;  %v3571_v17 = vld [vmem:[%s5446_s4] ss:$0 sm:$0xff]  ;;  %s5411_s0 = smov 8   ;;  %s5410_s3 = smov 16  }
  0xa0   : > { %3781 = vmatprep.mubr.msk.f32.mxu0 %vm4507_vm0, %v4506_v1  ;;  %4024 = vmatprep.subr.bf16.mxu1 %v4508_v2  ;;  %v858_v37 = vld [vmem:[%s5447_s30] sm:$0xff]  ;;  %v4931_v59 = vrot.slane %v4819_v9, %v1404_v58  ;;  %s5409_s25 = smov 24   ;;  %s5451_s15 = sld [smem:[#allocation25_spill]] }
  0xa1   : > { %4020 = vmatpush3.bf16.msra.mxu0 %v4019_v16  ;;  %s5453_s23 = sld [smem:[#allocation35_spill]]  ;;  %s3371_s19 = sshll.u32 %s4963_s20, 4  ;;  %s5254_s19 = int_to_ptr.vmem [resolvable:$true] %s3371_s19 }
  0xa2   : > { %4021 = vmatprep.subr.bf16.mxu0 %v4508_v2  ;;  %vm1406_vm4 = vcmp.eq.s32.totalorder %v4931_v59, 1  ;;  %s4516_s22 = smov [#allocation12]  }
  0xa3   : > { %s4368_s28 = sshll.u32 %s4516_s22, 4  ;;  %s4369_s28 = int_to_ptr.vmem [resolvable:$false] %s4368_s28 }
  0xa4   : > { %p4371_p6 = scmp.lt.s32.totalorder %s5254_s19, %s4369_s28 }
  0xa5   : > { %4023 = vmatpush3.bf16.msra.mxu0 %v4022_v27 }
  0xa6   : > { %4030 = vmatprep.subr.bf16.mxu0 %v4508_v2  ;;  %p5454_p11 = scmp.ne.s32.totalorder %s5451_s15, 0 }
 0x172   : > { %v767_v18 = vpop.f32.mrb[0].mxu0 }
 0x173   : > { %v768_v19 = vadd.f32 %v3571_v17, %v767_v18  ;;  %v3761_v20 = vpop.f32.mrb[1].mxu0 }
 0x175   : > { %v771_v21 = vmax.f32 %v768_v19, 0.0 }
 0x177   : > { %3771 = vmatmul.mubr.msk.f32.vlgmr.msra.gmra.mrb[0].mxu1 %vm783_vm3, %v771_v21 }
 0x178   : > { %3792 = vmatprep.mubr.msk.f32.mxu1 %vm4507_vm0, %v4506_v1  ;;  %4026 = vmatpush3.bf16.msra.mxu1 %v4025_v24 }
 0x179   : > { %4027 = vmatprep.subr.bf16.mxu1 %v4508_v2 }
 0x17c   : > { %4029 = vmatpush3.bf16.msra.mxu1 %v4028_v30 }
 0x17d   : > { %3816 = vmatprep.subr.mxu1 %v4506_v1 }
 0x24a   : > { %v853_v32 = vpop.f32.mrb[0].mxu1 }
 0x24b   : > { %v854_v33 = vadd.f32 %v3573_v31, %v853_v32  ;;  %v3772_v34 = vpop.f32.mrb[1].mxu1 }
 0x24d   : > { %v857_v38 = vmax.f32 %v854_v33, 0.0 }
 0x24f   : > { %v4872_v40 = vadd.f32 %v858_v37, %v857_v38 }
 0x251   : > { %3782 = vmatmul.mubr.msk.f32.vlgmr.msra.gmra.mrb[2].mxu0 %vm783_vm3, %v4872_v40  ;;  %3793 = vmatmul.mubr.msk.f32.vlgmr.msra.gmra.mrb[2].mxu1 %vm783_vm3, %v4872_v40 }
 0x252   : > { %4032 = vmatpush3.bf16.msra.mxu0 %v4031_v39  ;;  %3803 = vmatprep.mubr.msk.f32.mxu0 %vm4507_vm0, %v4506_v1 }
 0x253   : > { %4033 = vmatprep.subr.bf16.mxu0 %v4508_v2  ;;  %3818 = vmatprep.mubr.msk.f32.mxu1 %vm4507_vm0, %v4506_v1 }
 0x256   : > { %4035 = vmatpush3.bf16.msra.mxu0 %v4034_v43 }
 0x257   : > { %3806 = vmatprep.subr.mxu0 %v4506_v1 }
 0x259   : > { %3804 = vmatmul.mubr.msk.f32.vlgmr.msra.gmra.mrb[4].mxu0 %vm783_vm3, %v4872_v40 }
 0x25a   : > { %3808 = vmatprep.mubr.msk.f32.mxu0 %vm4507_vm0, %v4506_v1 }
 0x324   : > { %v935_v44 = vpop.f32.mrb[2].mxu0  ;;  %v1009_v45 = vpop.f32.mrb[2].mxu1 }
 0x325   : > { %1243 = vrot.lane.b32.xlu1 %v1009_v45, %s4510_s26  ;;  %1165 = vrot.lane.b32.xlu0 %v1009_v45, %s4511_s27  ;;  %v3783_v46 = vpop.f32.mrb[3].mxu0  ;;  %v3794_v47 = vpop.f32.mrb[3].mxu1 }
 0x326   : > { %3807 = vmatpush3.xpose.msk.msra.mxu0 %vm697_vm1, %v1009_v45 }
 0x327   : > { %3811 = vmatprep.subr.mxu0 %v4506_v1 }
 0x329   : > { %3809 = vmatmul.mubr.msk.f32.vlgmr.msra.gmra.mrb[6].mxu0 %vm697_vm1, %v935_v44  ;;  %1321 = vrot.lane.b32.xlu1 %v1009_v45, %s4512_s29 }
 0x32a   : > { %1163 = vrot.lane.b32.xlu0 %v935_v44, %s4511_s27  ;;  %3813 = vmatprep.mubr.msk.f32.mxu0 %vm4507_vm0, %v4506_v1 }
 0x32c   : > { %v4903_v48 = vpop.f32.mrb[4].mxu0 }
 0x32d   : > { %v3805_v49 = vpop.f32.mrb[5].mxu0  ;;  %1319 = vrot.lane.b32.xlu1 %v935_v44, %s4512_s29 }
 0x32e   : > { %1241 = vrot.lane.b32.xlu0 %v935_v44, %s4510_s26 }
 0x397   : > { %v1244_v50 = vpop.permute.xlu1 %1243  ;;  %v1166_v51 = vpop.permute.xlu0 %1165 }
 0x398   : > { %3812 = vmatpush3.xpose.msk.msra.mxu0 %vm697_vm1, %v1166_v51  ;;  %3817 = vmatpush3.xpose.msk.msra.mxu1 %vm697_vm1, %v1244_v50 }
 0x399   : > { %3821 = vmatprep.subr.mxu0 %v4506_v1  ;;  %3826 = vmatprep.subr.mxu1 %v4506_v1 }
 0x39b   : > { %v1322_v52 = vpop.permute.xlu1 %1321 }
 0x39c   : > { %v1164_v53 = vpop.permute.xlu0 %1163 }
 0x39d   : > { %3814 = vmatmul.mubr.msk.f32.vlgmr.msra.gmra.mrb[8].mxu0 %vm697_vm1, %v1164_v53 }
 0x39e   : > { %3822 = vmatpush3.xpose.msk.msra.mxu0 %vm697_vm1, %v1322_v52  ;;  %3823 = vmatprep.mubr.msk.f32.mxu0 %vm4507_vm0, %v4506_v1 }
 0x39f   : > { %v1320_v54 = vpop.permute.xlu1 %1319  ;;  %3831 = vmatprep.subr.mxu0 %v4506_v1 }
 0x3a0   : > { %v1242_v55 = vpop.permute.xlu0 %1241 }
 0x3a1   : > { %3819 = vmatmul.mubr.msk.f32.vlgmr.msra.gmra.mrb[4].mxu1 %vm697_vm1, %v1242_v55  ;;  %3824 = vmatmul.mubr.msk.f32.vlgmr.msra.gmra.mrb[10].mxu0 %vm697_vm1, %v1320_v54 }
 0x3a2   : > { %3827 = vmatpush3.msra.mxu1 %v4903_v48  ;;  %3828 = vmatprep.mubr.msk.f32.mxu1 %vm4507_vm0, %v4506_v1 }
 0x3a3   : > { %3836 = vmatprep.subr.mxu1 %v4506_v1  ;;  %3833 = vmatprep.mubr.msk.f32.mxu0 %vm4507_vm0, %v4506_v1 }
 0x3fc   : > { %v1159_v60 = vpop.f32.mrb[6].mxu0 }
 0x3fd   : > { %v1397_v61 = vmul.f32 0.35355338, %v1159_v60  ;;  %v3810_v62 = vpop.f32.mrb[7].mxu0  ;;  %v1778_v60 = vld [vmem:[#allocation8] sm:$0xff] }
 0x3ff   : > { %v1407_v63 = vsel %vm1406_vm4, -1e+09, %v1397_v61  ;;  %v1779_v61 = vld [vmem:[#allocation8 + $0x8] sm:$0xff] }
 0x400   : > { %v1411_v0 = vsel %vm697_vm1, %v1407_v63, -inf  ;;  %v4037_v62 = vpack.c.bf16 %v1779_v61, %v1778_v60 }
 0x401   : > { %1412 = vmax.xlane.f32.xlu0 %v1411_v0  ;;  %v1781_v0 = vld [vmem:[#allocation8 + $0x18] sm:$0xff] }
 0x470   : > { %v1237_v3 = vpop.f32.mrb[8].mxu0 }
 0x471   : > { %v1398_v4 = vmul.f32 0.35355338, %v1237_v3  ;;  %v3815_v5 = vpop.f32.mrb[9].mxu0 }
 0x473   : > { %v1408_v6 = vsel %vm1406_vm4, -1e+09, %v1398_v4 }
 0x474   : > { %v1315_v7 = vpop.f32.mrb[4].mxu1  ;;  %v1393_v8 = vpop.f32.mrb[10].mxu0  ;;  %v1414_v9 = vsel %vm697_vm1, %v1408_v6, -inf }
 0x475   : > { %v1399_v10 = vmul.f32 0.35355338, %v1315_v7  ;;  %v1400_v11 = vmul.f32 0.35355338, %v1393_v8  ;;  %v3820_v12 = vpop.f32.mrb[5].mxu1  ;;  %1415 = vmax.xlane.f32.xlu1 %v1414_v9  ;;  %v3825_v13 = vpop.f32.mrb[11].mxu0 }
 0x477   : > { %v1409_v14 = vsel %vm1406_vm4, -1e+09, %v1399_v10  ;;  %v1410_v16 = vsel %vm1406_vm4, -1e+09, %v1400_v11 }
 0x478   : > { %v1417_v15 = vsel %vm697_vm1, %v1409_v14, -inf  ;;  %v1420_v17 = vsel %vm697_vm1, %v1410_v16, -inf }
 0x479   : > { %1418 = vmax.xlane.f32.xlu0 %v1417_v15 }
 0x47d   : > { %1421 = vmax.xlane.f32.xlu0 %v1420_v17 }
 0x486   : > { %1533 = vrot.lane.b32.xlu1 %v4903_v48, %s4511_s27 }
 0x48e   : > { %v1413_v18 = vpop.xlane.xlu0 %1412 }
 0x48f   : > { %v1423_v19 = vsub.f32 %v1407_v63, %v1413_v18  ;;  %v1780_v63 = vld [vmem:[#allocation8 + $0x10] sm:$0xff] }
 0x490   : > { %v4040_v3 = vpack.c.bf16 %v1781_v0, %v1780_v63  ;;  %v3593_v0 = vld [vmem:[%s5379_s7 + $0x20] sm:$0xff] }
 0x491   : > { %v1427_v20 = vmul.f32 1.442695, %v1423_v19 }
 0x493   : > { %4212 = vpow2.f32 %v1427_v20 }
 0x49d   : > { %v4213_v21 = vpop.eup %4212 }
 0x49e   : > { %v1435_v22 = vsel %vm697_vm1, %v4213_v21, 0.0 }
 0x4aa   : > { %1436 = vadd.xlane.f32.xlu1 %v1435_v22 }
 0x502   : > { %v1416_v23 = vpop.xlane.xlu1 %1415 }
 0x503   : > { %v1424_v24 = vsub.f32 %v1408_v6, %v1416_v23 }
 0x505   : > { %v1429_v25 = vmul.f32 1.442695, %v1424_v24 }
 0x506   : > { %v1419_v26 = vpop.xlane.xlu0 %1418  ;;  %v1534_v27 = vpop.permute.xlu1 %1533 }
 0x507   : > { %4214 = vpow2.f32 %v1429_v25  ;;  %v1425_v28 = vsub.f32 %v1409_v14, %v1419_v26  ;;  %3832 = vmatpush3.msra.mxu0 %v1534_v27  ;;  %v1869_v25 = vld [vmem:[#allocation9] sm:$0xff]  ;;  %v1870_v26 = vld [vmem:[#allocation9 + $0x8] sm:$0xff]  ;;  %v1871_v27 = vld [vmem:[#allocation9 + $0x10] sm:$0xff] }
 0x508   : > { %3841 = vmatprep.subr.mxu0 %v4506_v1 }
 0x509   : > { %v1431_v29 = vmul.f32 1.442695, %v1425_v28  ;;  %v4043_v28 = vpack.c.bf16 %v1870_v26, %v1869_v25 }
 0x50a   : > { %v1422_v30 = vpop.xlane.xlu0 %1421 }
 0x50b   : > { %4216 = vpow2.f32 %v1431_v29  ;;  %v1426_v31 = vsub.f32 %v1410_v16, %v1422_v30  ;;  %v1872_v29 = vld [vmem:[#allocation9 + $0x18] sm:$0xff] }
 0x50c   : > { %v4046_v30 = vpack.c.bf16 %v1872_v29, %v1871_v27 }
 0x50d   : > { %v1433_v32 = vmul.f32 1.442695, %v1426_v31  ;;  %v1948_v31 = vld [vmem:[%s5384_s12 + $0x8] sm:$0xff] }
 0x50f   : > { %4218 = vpow2.f32 %v1433_v32  ;;  %v1949_v32 = vld [vmem:[%s5384_s12 + $0x10] sm:$0xff] }
 0x511   : > { %v4215_v33 = vpop.eup %4214 }
 0x512   : > { %v1438_v34 = vsel %vm697_vm1, %v4215_v33, 0.0 }
 0x513   : > { %1439 = vadd.xlane.f32.xlu0 %v1438_v34  ;;  %v1950_v34 = vld [vmem:[%s5384_s12 + $0x18] sm:$0xff] }
 0x515   : > { %v4217_v35 = vpop.eup %4216 }
 0x516   : > { %v1441_v36 = vsel %vm697_vm1, %v4217_v35, 0.0 }
 0x517   : > { %1442 = vadd.xlane.f32.xlu1 %v1441_v36  ;;  %v1951_v36 = vld [vmem:[%s5384_s12 + $0x20] sm:$0xff] }
 0x519   : > { %v4219_v37 = vpop.eup %4218 }
 0x51a   : > { %v1444_v38 = vsel %vm697_vm1, %v4219_v37, 0.0 }
 0x51b   : > { %1445 = vadd.xlane.f32.xlu0 %v1444_v38 }
 0x528   : > { %1685 = vrot.lane.b32.xlu1 %v4903_v48, %s4512_s29 }
 0x531   : > { %1609 = vrot.lane.b32.xlu0 %v4903_v48, %s4510_s26 }
 0x537   : > { %v1437_v39 = vpop.xlane.xlu1 %1436 }
 0x538   : > { %4220 = vrcp.f32 %v1437_v39 }
 0x542   : > { %v4221_v41 = vpop.eup %4220 }
 0x543   : > { %v1451_v42 = vmul.f32 %v4221_v41, %v4213_v21 }
 0x545   : > { %1455 = vst.msk [vmem:[%s4963_s20] sm:$0xff] %vm697_vm1, %v1451_v42  ;;  %3829 = vmatmul.mubr.msk.f32.vlgmr.msra.gmra.mrb[6].mxu1 %vm697_vm1, %v1451_v42 }
 0x546   : > { %3838 = vmatprep.mubr.msk.f32.mxu1 %vm4507_vm0, %v4506_v1 }
 0x5a0   : > { %v1440_v43 = vpop.xlane.xlu0 %1439 }
 0x5a1   : > { %4222 = vrcp.f32 %v1440_v43 }
 0x5a4   : > { %v1443_v44 = vpop.xlane.xlu1 %1442 }
 0x5a5   : > { %4224 = vrcp.f32 %v1443_v44 }
 0x5a8   : > { %v1446_v45 = vpop.xlane.xlu0 %1445  ;;  %v1686_v49 = vpop.permute.xlu1 %1685 }
 0x5a9   : > { %4226 = vrcp.f32 %v1446_v45  ;;  %v1953_v45 = vld [vmem:[%s5384_s12 + $0x30] sm:$0xff] }
 0x5ab   : > { %v4223_v46 = vpop.eup %4222 }
 0x5ac   : > { %v1452_v47 = vmul.f32 %v4223_v46, %v4215_v33  ;;  %v1610_v48 = vpop.permute.xlu0 %1609  ;;  %v1954_v46 = vld [vmem:[%s5384_s12 + $0x38] sm:$0xff] }
 0x5ad   : > { %3837 = vmatpush3.msra.mxu1 %v1610_v48 }
 0x5ae   : > { %1456 = vst.msk [vmem:[%s4963_s20 + $0x8] sm:$0xff] %vm697_vm1, %v1452_v47  ;;  %3834 = vmatmul.mubr.msk.f32.vlgmr.msra.gmra.mrb[12].mxu0 %vm697_vm1, %v1452_v47  ;;  %4036 = vmatprep.subr.bf16.mxu1 %v4508_v2  ;;  %v4058_v47 = vpack.c.bf16 %v1954_v46, %v1953_v45 }
 0x5af   : > { %v4225_v50 = vpop.eup %4224  ;;  %3842 = vmatpush3.msra.mxu0 %v1686_v49  ;;  %3843 = vmatprep.mubr.msk.f32.mxu0 %vm4507_vm0, %v4506_v1 }
 0x5b0   : > { %v1453_v51 = vmul.f32 %v4225_v50, %v4217_v35  ;;  %4042 = vmatprep.subr.bf16.mxu0 %v4508_v2  ;;  %v4052_v35 = vpack.c.bf16 %v1950_v34, %v1949_v32 }
 0x5b2   : > { %1457 = vst.msk [vmem:[%s4963_s20 + $0x10] sm:$0xff] %vm697_vm1, %v1453_v51  ;;  %3839 = vmatmul.mubr.msk.f32.vlgmr.msra.gmra.mrb[8].mxu1 %vm697_vm1, %v1453_v51 }
 0x5b3   : > { %v4227_v52 = vpop.eup %4226  ;;  %3854 = vmatprep.mubr.msk.f32.mxu1 %vm4507_vm0, %v4506_v1  ;;  %4038 = vmatpush3.bf16.msra.mxu1 %v4037_v62 }
 0x5b4   : > { %v1454_v53 = vmul.f32 %v4227_v52, %v4219_v37  ;;  %4039 = vmatprep.subr.bf16.mxu1 %v4508_v2  ;;  %v1952_v37 = vld [vmem:[%s5384_s12 + $0x28] sm:$0xff] }
 0x5b5   : > { %v4055_v38 = vpack.c.bf16 %v1952_v37, %v1951_v36 }
 0x5b6   : > { %1458 = vst.msk [vmem:[%s4963_s20 + $0x18] sm:$0xff] %vm697_vm1, %v1454_v53  ;;  %3844 = vmatmul.mubr.msk.f32.vlgmr.msra.gmra.mrb[14].mxu0 %vm697_vm1, %v1454_v53 }
 0x5b7   : > { %3865 = vmatprep.mubr.msk.f32.mxu0 %vm4507_vm0, %v4506_v1  ;;  %4041 = vmatpush3.bf16.msra.mxu1 %v4040_v3  ;;  %v3594_v3 = vld [vmem:[%s5379_s7 + $0x28] sm:$0xff] }
 0x5b8   : > { %4048 = vmatprep.subr.bf16.mxu1 %v4508_v2  ;;  %4044 = vmatpush3.bf16.msra.mxu0 %v4043_v28 }
 0x5b9   : > { %4045 = vmatprep.subr.bf16.mxu0 %v4508_v2 }
 0x5bc   : > { %4047 = vmatpush3.bf16.msra.mxu0 %v4046_v30 }
 0x5bd   : > { %4060 = vmatprep.subr.bf16.mxu0 %v4508_v2 }
 0x618   : > { %v1528_v54 = vpop.f32.mrb[6].mxu1 }
 0x619   : > { %v3830_v55 = vpop.f32.mrb[7].mxu1 }
 0x681   : > { %v1605_v4 = vpop.f32.mrb[12].mxu0 }
 0x682   : > { %1762 = vrot.lane.b32.xlu1 %v1605_v4, %s5411_s0  ;;  %v3835_v5 = vpop.f32.mrb[13].mxu0  ;;  %v3603_v4 = vld [vmem:[%s5381_s9 + $0x20] sm:$0xff]  ;;  %s5452_s0 = sld [smem:[#allocation33_spill]] }
 0x683   : > { %v4061_v5 = vpack.c.bf16 %v3594_v3, %v3593_v0 }
 0x685   : > { %v1681_v6 = vpop.f32.mrb[8].mxu1 }
 0x686   : > { %1766 = vrot.lane.b32.xlu0 %v1681_v6, %s5410_s3  ;;  %v3840_v7 = vpop.f32.mrb[9].mxu1  ;;  %v3604_v6 = vld [vmem:[%s5381_s9 + $0x28] sm:$0xff]  ;;  %s3339_s3 = sand.u32 1, %s4644_s16  }
 0x687   : > { %v3595_v7 = vld [vmem:[%s5379_s7 + $0x30] sm:$0xff] }
 0x689   : > { %v1757_v8 = vpop.f32.mrb[14].mxu0 }
 0x68a   : > { %1770 = vrot.lane.b32.xlu1 %v1757_v8, %s5409_s25  ;;  %v3845_v9 = vpop.f32.mrb[15].mxu0  ;;  %v3596_v8 = vld [vmem:[%s5379_s7 + $0x38] sm:$0xff]  ;;  %s3643_s25 = sshll.u32 %s4644_s16, 9 }
 0x68b   : > { %v4073_v9 = vpack.c.bf16 %v3604_v6, %v3603_v4  ;;  %s5251_s18 = scalar_lea.hbm %s5453_s23, %s3643_s25 }
 0x6f4   : > { %v1763_v10 = vpop.permute.xlu1 %1762 }
 0x6f5   : > { %v1773_v12 = vsel %vm697_vm1, %v1528_v54, %v1763_v10  ;;  %v3605_v10 = vld [vmem:[%s5381_s9 + $0x30] sm:$0xff] }
 0x6f8   : > { %v1767_v11 = vpop.permute.xlu0 %1766 }
 0x6f9   : > { %v1775_v13 = vsel %vm1774_vm5, %v1773_v12, %v1767_v11  ;;  %v3606_v11 = vld [vmem:[%s5381_s9 + $0x38] sm:$0xff]  ;;  %v4064_v12 = vpack.c.bf16 %v3596_v8, %v3595_v7 }
 0x6fc   : > { %v1771_v14 = vpop.permute.xlu1 %1770 }
 0x6fd   : > { %v1777_v15 = vsel %vm1776_vm6, %v1775_v13, %v1771_v14  ;;  %v4076_v13 = vpack.c.bf16 %v3606_v11, %v3605_v10 }
 0x6fe   : > { %3855 = vmatmul.mubr.msk.f32.vlgmr.msra.gmra.mrb[10].mxu1 %vm783_vm3, %v1777_v15 }
 0x6ff   : > { %3884 = vmatprep.mubr.msk.f32.mxu1 %vm4507_vm0, %v4506_v1 }
 0x7d1   : > { %v1851_v16 = vpop.f32.mrb[10].mxu1 }
 0x7d2   : > { %v1852_v17 = vadd.f32 %v1851_v16, %v4872_v40  ;;  %v3856_v18 = vpop.f32.mrb[11].mxu1  ;;  %v1947_v40 = vld [vmem:[%s5384_s12] sm:$0xff] }
 0x7d3   : > { %v4049_v33 = vpack.c.bf16 %v1948_v31, %v1947_v40  ;;  %v3599_v18 = vld [vmem:[%s5380_s8 + $0x28] sm:$0xff] }
 0x7d4   : > { %v1855_v19 = vsel %vm783_vm3, %v1852_v17, 0.0 }
 0x7d5   : > { %1856 = vadd.xlane.f32.xlu0 %v1855_v19  ;;  %4050 = vmatpush3.bf16.msra.mxu1 %v4049_v33 }
 0x7d6   : > { %4051 = vmatprep.subr.bf16.mxu1 %v4508_v2 }
 0x7d9   : > { %4053 = vmatpush3.bf16.msra.mxu1 %v4052_v35 }
 0x7da   : > { %4054 = vmatprep.subr.bf16.mxu1 %v4508_v2 }
 0x7dd   : > { %4056 = vmatpush3.bf16.msra.mxu1 %v4055_v38 }
 0x7de   : > { %4057 = vmatprep.subr.bf16.mxu1 %v4508_v2 }
 0x7e1   : > { %4059 = vmatpush3.bf16.msra.mxu1 %v4058_v47 }
 0x7e2   : > { %4072 = vmatprep.subr.bf16.mxu1 %v4508_v2 }
 0x862   : > { %v1857_v20 = vpop.xlane.xlu0 %1856 }
 0x863   : > { %v1859_v21 = vmul.f32 0.03125, %v1857_v20 }
 0x865   : > { %v1860_v22 = vsub.f32 %v1852_v17, %v1859_v21  ;;  %v3598_v17 = vld [vmem:[%s5380_s8 + $0x20] sm:$0xff] }
 0x866   : > { %v4067_v20 = vpack.c.bf16 %v3599_v18, %v3598_v17 }
 0x867   : > { %v1861_v23 = vmul.f32 %v1860_v22, %v1860_v22 }
 0x869   : > { %v1862_v24 = vsel %vm783_vm3, %v1861_v23, 0.0  ;;  %v3601_v23 = vld [vmem:[%s5380_s8 + $0x38] sm:$0xff] }
 0x86a   : > { %1863 = vadd.xlane.f32.xlu1 %v1862_v24 }
 0x8f7   : > { %v1864_v39 = vpop.xlane.xlu1 %1863 }
 0x8f8   : > { %v1865_v41 = vmul.f32 0.03125, %v1864_v39 }
 0x8fa   : > { %v1866_v42 = vadd.f32 1e-05, %v1865_v41 }
 0x8fc   : > { %4228 = vrsqrt.f32 %v1866_v42 }
 0x906   : > { %v4229_v43 = vpop.eup %4228 }
 0x907   : > { %v1868_v44 = vmul.f32 %v4229_v43, %v1860_v22  ;;  %v3600_v22 = vld [vmem:[%s5380_s8 + $0x30] sm:$0xff] }
 0x908   : > { %v4070_v24 = vpack.c.bf16 %v3601_v23, %v3600_v22 }
 0x909   : > { %3866 = vmatmul.mubr.msk.f32.vlgmr.msra.gmra.mrb[16].mxu0 %vm783_vm3, %v1868_v44 }
 0x90a   : > { %3895 = vmatprep.mubr.msk.f32.mxu0 %vm4507_vm0, %v4506_v1  ;;  %4062 = vmatpush3.bf16.msra.mxu0 %v4061_v5 }
 0x90b   : > { %4063 = vmatprep.subr.bf16.mxu0 %v4508_v2 }
 0x90e   : > { %4065 = vmatpush3.bf16.msra.mxu0 %v4064_v12 }
 0x90f   : > { %4066 = vmatprep.subr.bf16.mxu0 %v4508_v2 }
 0x9dc   : > { %v1942_v48 = vpop.f32.mrb[16].mxu0 }
 0x9dd   : > { %v1946_v49 = vmax.f32 %v1942_v48, 0.0  ;;  %v3867_v50 = vpop.f32.mrb[17].mxu0 }
 0x9df   : > { %3885 = vmatmul.mubr.msk.f32.vlgmr.msra.gmra.mrb[12].mxu1 %vm1955_vm7, %v1946_v49 }
 0x9e0   : > { %3917 = vmatprep.mubr.msk.f32.mxu1 %vm4507_vm0, %v4506_v1  ;;  %4074 = vmatpush3.bf16.msra.mxu1 %v4073_v9 }
 0x9e1   : > { %4075 = vmatprep.subr.bf16.mxu1 %v4508_v2 }
 0x9e4   : > { %4077 = vmatpush3.bf16.msra.mxu1 %v4076_v13 }
 0x9e5   : > { %3930 = vmatprep.subr.mxu1 %v4506_v1 }
 0xab2   : > { %v2025_v51 = vpop.f32.mrb[12].mxu1 }
 0xab3   : > { %v2026_v52 = vadd.f32 %v2025_v51, %v1868_v44  ;;  %v3886_v53 = vpop.f32.mrb[13].mxu1 }
 0xab5   : > { %v2029_v54 = vsel %vm783_vm3, %v2026_v52, 0.0 }
 0xab6   : > { %2030 = vadd.xlane.f32.xlu0 %v2029_v54 }
 0xb43   : > { %v2031_v55 = vpop.xlane.xlu0 %2030 }
 0xb44   : > { %v2032_v60 = vmul.f32 0.03125, %v2031_v55 }
 0xb46   : > { %v2033_v61 = vsub.f32 %v2026_v52, %v2032_v60 }
 0xb48   : > { %v2034_v62 = vmul.f32 %v2033_v61, %v2033_v61 }
 0xb4a   : > { %v2035_v63 = vsel %vm783_vm3, %v2034_v62, 0.0 }
 0xb4b   : > { %2036 = vadd.xlane.f32.xlu0 %v2035_v63 }
 0xbd8   : > { %v2037_v14 = vpop.xlane.xlu0 %2036 }
 0xbd9   : > { %v2038_v15 = vmul.f32 0.03125, %v2037_v14 }
 0xbdb   : > { %v2039_v16 = vadd.f32 1e-05, %v2038_v15 }
 0xbdd   : > { %4230 = vrsqrt.f32 %v2039_v16 }
 0xbe7   : > { %v4231_v19 = vpop.eup %4230 }
 0xbe8   : > { %v5073_v21 = vmul.f32 %v4231_v19, %v2033_v61 }
 0xbea   : > { %3896 = vmatmul.mubr.msk.f32.vlgmr.msra.gmra.mrb[18].mxu0 %vm783_vm3, %v5073_v21  ;;  %3918 = vmatmul.mubr.msk.f32.vlgmr.msra.gmra.mrb[14].mxu1 %vm783_vm3, %v5073_v21 }
 0xbeb   : > { %4068 = vmatpush3.bf16.msra.mxu0 %v4067_v20  ;;  %3906 = vmatprep.mubr.msk.f32.mxu0 %vm4507_vm0, %v4506_v1 }
 0xbec   : > { %4069 = vmatprep.subr.bf16.mxu0 %v4508_v2  ;;  %3932 = vmatprep.mubr.msk.f32.mxu1 %vm4507_vm0, %v4506_v1 }
 0xbef   : > { %4071 = vmatpush3.bf16.msra.mxu0 %v4070_v24 }
 0xbf0   : > { %3920 = vmatprep.subr.mxu0 %v4506_v1 }
 0xbf2   : > { %3907 = vmatmul.mubr.msk.f32.vlgmr.msra.gmra.mrb[20].mxu0 %vm783_vm3, %v5073_v21 }
 0xbf3   : > { %3922 = vmatprep.mubr.msk.f32.mxu0 %vm4507_vm0, %v4506_v1 }
 0xcbd   : > { %v2116_v25 = vpop.f32.mrb[18].mxu0  ;;  %v5095_v26 = vpop.f32.mrb[14].mxu1 }
 0xcbe   : > { %v3919_v27 = vpop.f32.mrb[15].mxu1  ;;  %2346 = vrot.lane.b32.xlu0 %v2116_v25, %s4511_s27  ;;  %v3897_v28 = vpop.f32.mrb[19].mxu0 }
 0xcc2   : > { %2424 = vrot.lane.b32.xlu0 %v2116_v25, %s4510_s26 }
 0xcc5   : > { %v2191_v29 = vpop.f32.mrb[20].mxu0 }
 0xcc6   : > { %2348 = vrot.lane.b32.xlu1 %v2191_v29, %s4511_s27  ;;  %v3908_v30 = vpop.f32.mrb[21].mxu0  ;;  %3921 = vmatpush3.xpose.msk.msra.mxu0 %vm697_vm1, %v2191_v29 }
 0xcc7   : > { %3925 = vmatprep.subr.mxu0 %v4506_v1 }
 0xcc9   : > { %3923 = vmatmul.mubr.msk.f32.vlgmr.msra.gmra.mrb[22].mxu0 %vm697_vm1, %v2116_v25 }
 0xcca   : > { %2426 = vrot.lane.b32.xlu1 %v2191_v29, %s4510_s26  ;;  %3927 = vmatprep.mubr.msk.f32.mxu0 %vm4507_vm0, %v4506_v1 }
 0xcce   : > { %2504 = vrot.lane.b32.xlu1 %v2191_v29, %s4512_s29 }
 0xcd2   : > { %2502 = vrot.lane.b32.xlu1 %v2116_v25, %s4512_s29 }
 0xd30   : > { %v2347_v31 = vpop.permute.xlu0 %2346 }
 0xd34   : > { %v2425_v33 = vpop.permute.xlu0 %2424 }
 0xd38   : > { %v2349_v40 = vpop.permute.xlu1 %2348 }
 0xd39   : > { %3926 = vmatpush3.xpose.msk.msra.mxu0 %vm697_vm1, %v2349_v40 }
 0xd3a   : > { %3935 = vmatprep.subr.mxu0 %v4506_v1 }
 0xd3c   : > { %v2427_v32 = vpop.permute.xlu1 %2426  ;;  %3928 = vmatmul.mubr.msk.f32.vlgmr.msra.gmra.mrb[24].mxu0 %vm697_vm1, %v2347_v31 }
 0xd3d   : > { %3931 = vmatpush3.xpose.msk.msra.mxu1 %vm697_vm1, %v2427_v32  ;;  %3937 = vmatprep.mubr.msk.f32.mxu0 %vm4507_vm0, %v4506_v1 }
 0xd3e   : > { %3940 = vmatprep.subr.mxu1 %v4506_v1 }
 0xd40   : > { %3933 = vmatmul.mubr.msk.f32.vlgmr.msra.gmra.mrb[16].mxu1 %vm697_vm1, %v2425_v33  ;;  %v2505_v34 = vpop.permute.xlu1 %2504 }
 0xd41   : > { %3936 = vmatpush3.xpose.msk.msra.mxu0 %vm697_vm1, %v2505_v34  ;;  %3941 = vmatpush3.msra.mxu1 %v5095_v26 }
 0xd42   : > { %3945 = vmatprep.subr.mxu0 %v4506_v1  ;;  %3942 = vmatprep.mubr.msk.f32.mxu1 %vm4507_vm0, %v4506_v1 }
 0xd43   : > { %3950 = vmatprep.subr.mxu1 %v4506_v1 }
 0xd44   : > { %v2503_v35 = vpop.permute.xlu1 %2502 }
 0xd45   : > { %3938 = vmatmul.mubr.msk.f32.vlgmr.msra.gmra.mrb[26].mxu0 %vm697_vm1, %v2503_v35  ;;  %v2954_v35 = vld [vmem:[#allocation8 + $0x20] sm:$0xff] }
 0xd46   : > { %3947 = vmatprep.mubr.msk.f32.mxu0 %vm4507_vm0, %v4506_v1 }
 0xd9c   : > { %v2342_v36 = vpop.f32.mrb[22].mxu0 }
 0xd9d   : > { %v2580_v37 = vmul.f32 0.35355338, %v2342_v36  ;;  %v3924_v38 = vpop.f32.mrb[23].mxu0  ;;  %v2955_v36 = vld [vmem:[#allocation8 + $0x28] sm:$0xff] }
 0xd9e   : > { %v2956_v38 = vld [vmem:[#allocation8 + $0x30] sm:$0xff] }
 0xd9f   : > { %v2584_v39 = vsel %vm1406_vm4, -1e+09, %v2580_v37  ;;  %v4079_v37 = vpack.c.bf16 %v2955_v36, %v2954_v35 }
 0xda0   : > { %v2588_v41 = vsel %vm697_vm1, %v2584_v39, -inf }
 0xda1   : > { %2589 = vmax.xlane.f32.xlu0 %v2588_v41 }
 0xe0f   : > { %v2420_v42 = vpop.f32.mrb[24].mxu0 }
 0xe10   : > { %v2581_v43 = vmul.f32 0.35355338, %v2420_v42  ;;  %v3929_v44 = vpop.f32.mrb[25].mxu0 }
 0xe12   : > { %v2585_v45 = vsel %vm1406_vm4, -1e+09, %v2581_v43 }
 0xe13   : > { %v2498_v46 = vpop.f32.mrb[16].mxu1  ;;  %v2591_v47 = vsel %vm697_vm1, %v2585_v45, -inf }
 0xe14   : > { %v2582_v48 = vmul.f32 0.35355338, %v2498_v46  ;;  %v3934_v49 = vpop.f32.mrb[17].mxu1  ;;  %2592 = vmax.xlane.f32.xlu1 %v2591_v47 }
 0xe16   : > { %v2586_v50 = vsel %vm1406_vm4, -1e+09, %v2582_v48 }
 0xe17   : > { %v2594_v51 = vsel %vm697_vm1, %v2586_v50, -inf }
 0xe18   : > { %2595 = vmax.xlane.f32.xlu0 %v2594_v51  ;;  %v2576_v52 = vpop.f32.mrb[26].mxu0 }
 0xe19   : > { %v2583_v53 = vmul.f32 0.35355338, %v2576_v52  ;;  %v3939_v54 = vpop.f32.mrb[27].mxu0 }
 0xe1b   : > { %v2587_v55 = vsel %vm1406_vm4, -1e+09, %v2583_v53 }
 0xe1c   : > { %v2597_v60 = vsel %vm697_vm1, %v2587_v55, -inf }
 0xe1d   : > { %2598 = vmax.xlane.f32.xlu0 %v2597_v60 }
 0xe25   : > { %2710 = vrot.lane.b32.xlu1 %v5095_v26, %s4511_s27  ;;  %s5150_s27 = scalar_lea.vmem [#allocation14], %s3568_s2  ;;  %s5450_s2 = smov 24  }
 0xe2e   : > { %v2590_v61 = vpop.xlane.xlu0 %2589 }
 0xe2f   : > { %v2600_v62 = vsub.f32 %v2584_v39, %v2590_v61  ;;  %v2957_v39 = vld [vmem:[#allocation8 + $0x38] sm:$0xff] }
 0xe30   : > { %v4082_v41 = vpack.c.bf16 %v2957_v39, %v2956_v38  ;;  %v3219_v38 = vld [vmem:[%s5385_s13 + $0x8] sm:$0xff]  ;;  %v3220_v39 = vld [vmem:[%s5385_s13 + $0x10] sm:$0xff] }
 0xe31   : > { %v2604_v63 = vmul.f32 1.442695, %v2600_v62 }
 0xe33   : > { %4232 = vpow2.f32 %v2604_v63 }
 0xe3d   : > { %v4233_v0 = vpop.eup %4232 }
 0xe3e   : > { %v2612_v3 = vsel %vm697_vm1, %v4233_v0, 0.0 }
 0xe49   : > { %2613 = vadd.xlane.f32.xlu1 %v2612_v3 }
 0xea1   : > { %v2593_v4 = vpop.xlane.xlu1 %2592 }
 0xea2   : > { %v2601_v5 = vsub.f32 %v2585_v45, %v2593_v4 }
 0xea4   : > { %v2606_v6 = vmul.f32 1.442695, %v2601_v5  ;;  %v3045_v5 = vld [vmem:[#allocation9 + $0x20] sm:$0xff] }
 0xea5   : > { %v2596_v7 = vpop.xlane.xlu0 %2595  ;;  %v2711_v59 = vpop.permute.xlu1 %2710 }
 0xea6   : > { %4234 = vpow2.f32 %v2606_v6  ;;  %v2602_v8 = vsub.f32 %v2586_v50, %v2596_v7  ;;  %3946 = vmatpush3.msra.mxu0 %v2711_v59  ;;  %v3046_v6 = vld [vmem:[#allocation9 + $0x28] sm:$0xff]  ;;  %v3047_v7 = vld [vmem:[#allocation9 + $0x30] sm:$0xff] }
 0xea7   : > { %3955 = vmatprep.subr.mxu0 %v4506_v1  ;;  %v4085_v59 = vpack.c.bf16 %v3046_v6, %v3045_v5 }
 0xea8   : > { %v2608_v9 = vmul.f32 1.442695, %v2602_v8  ;;  %v3048_v8 = vld [vmem:[#allocation9 + $0x38] sm:$0xff] }
 0xeaa   : > { %4236 = vpow2.f32 %v2608_v9  ;;  %v2599_v10 = vpop.xlane.xlu0 %2598  ;;  %v4088_v9 = vpack.c.bf16 %v3048_v8, %v3047_v7 }
 0xeab   : > { %v2603_v11 = vsub.f32 %v2587_v55, %v2599_v10  ;;  %v3623_v10 = vld [vmem:[%s5384_s12 + $0x48] sm:$0xff] }
 0xead   : > { %v2610_v12 = vmul.f32 1.442695, %v2603_v11  ;;  %v3624_v11 = vld [vmem:[%s5384_s12 + $0x50] sm:$0xff] }
 0xeaf   : > { %4238 = vpow2.f32 %v2610_v12 }
 0xeb0   : > { %v4235_v13 = vpop.eup %4234 }
 0xeb1   : > { %v2615_v14 = vsel %vm697_vm1, %v4235_v13, 0.0 }
 0xeb2   : > { %2616 = vadd.xlane.f32.xlu0 %v2615_v14 }
 0xeb4   : > { %v4237_v15 = vpop.eup %4236 }
 0xeb5   : > { %v2618_v16 = vsel %vm697_vm1, %v4237_v15, 0.0 }
 0xeb6   : > { %2619 = vadd.xlane.f32.xlu1 %v2618_v16  ;;  %v3627_v16 = vld [vmem:[%s5384_s12 + $0x68] sm:$0xff] }
 0xeb9   : > { %v4239_v17 = vpop.eup %4238 }
 0xeba   : > { %v2621_v18 = vsel %vm697_vm1, %v4239_v17, 0.0 }
 0xebb   : > { %2622 = vadd.xlane.f32.xlu0 %v2621_v18 }
 0xec7   : > { %2862 = vrot.lane.b32.xlu1 %v5095_v26, %s4512_s29  ;;  %s5449_s29 = smov 16  }
 0xed1   : > { %2786 = vrot.lane.b32.xlu0 %v5095_v26, %s4510_s26  ;;  %s5448_s26 = smov 8  }
 0xed6   : > { %v2614_v19 = vpop.xlane.xlu1 %2613 }
 0xed7   : > { %4240 = vrcp.f32 %v2614_v19 }
 0xee1   : > { %v4241_v20 = vpop.eup %4240 }
 0xee2   : > { %v2628_v22 = vmul.f32 %v4241_v20, %v4233_v0 }
 0xee4   : > { %2632 = vst.msk [vmem:[%s5150_s27] sm:$0xff] %vm697_vm1, %v2628_v22  ;;  %3943 = vmatmul.mubr.msk.f32.vlgmr.msra.gmra.mrb[18].mxu1 %vm697_vm1, %v2628_v22 }
 0xee5   : > { %3952 = vmatprep.mubr.msk.f32.mxu1 %vm4507_vm0, %v4506_v1 }
 0xf3f   : > { %v2617_v23 = vpop.xlane.xlu0 %2616 }
 0xf40   : > { %4242 = vrcp.f32 %v2617_v23 }
 0xf43   : > { %v2620_v24 = vpop.xlane.xlu1 %2619 }
 0xf44   : > { %4244 = vrcp.f32 %v2620_v24  ;;  %v3628_v24 = vld [vmem:[%s5384_s12 + $0x70] sm:$0xff] }
 0xf47   : > { %v2863_v29 = vpop.permute.xlu1 %2862 }
 0xf48   : > { %v2623_v25 = vpop.xlane.xlu0 %2622 }
 0xf49   : > { %4246 = vrcp.f32 %v2623_v25  ;;  %v3629_v25 = vld [vmem:[%s5384_s12 + $0x78] sm:$0xff] }
 0xf4a   : > { %v4243_v26 = vpop.eup %4242 }
 0xf4b   : > { %v2629_v27 = vmul.f32 %v4243_v26, %v4235_v13  ;;  %v3625_v13 = vld [vmem:[%s5384_s12 + $0x58] sm:$0xff]  ;;  %v4100_v26 = vpack.c.bf16 %v3629_v25, %v3628_v24 }
 0xf4c   : > { %v2787_v28 = vpop.permute.xlu0 %2786  ;;  %v4094_v14 = vpack.c.bf16 %v3625_v13, %v3624_v11 }
 0xf4d   : > { %2633 = vst.msk [vmem:[%s5150_s27 + $0x8] sm:$0xff] %vm697_vm1, %v2629_v27  ;;  %3948 = vmatmul.mubr.msk.f32.vlgmr.msra.gmra.mrb[28].mxu0 %vm697_vm1, %v2629_v27  ;;  %3951 = vmatpush3.msra.mxu1 %v2787_v28 }
 0xf4e   : > { %v4245_v30 = vpop.eup %4244  ;;  %3956 = vmatpush3.msra.mxu0 %v2863_v29  ;;  %3957 = vmatprep.mubr.msk.f32.mxu0 %vm4507_vm0, %v4506_v1 }
 0xf4f   : > { %v2630_v40 = vmul.f32 %v4245_v30, %v4237_v15  ;;  %4078 = vmatprep.subr.bf16.mxu1 %v4508_v2  ;;  %4084 = vmatprep.subr.bf16.mxu0 %v4508_v2  ;;  %v3626_v15 = vld [vmem:[%s5384_s12 + $0x60] sm:$0xff] }
 0xf51   : > { %2634 = vst.msk [vmem:[%s5150_s27 + $0x10] sm:$0xff] %vm697_vm1, %v2630_v40  ;;  %3953 = vmatmul.mubr.msk.f32.vlgmr.msra.gmra.mrb[20].mxu1 %vm697_vm1, %v2630_v40 }
 0xf52   : > { %3968 = vmatprep.mubr.msk.f32.mxu1 %vm4507_vm0, %v4506_v1  ;;  %4080 = vmatpush3.bf16.msra.mxu1 %v4079_v37  ;;  %v3218_v37 = vld [vmem:[%s5385_s13] sm:$0xff] }
 0xf53   : > { %v4247_v31 = vpop.eup %4246  ;;  %4081 = vmatprep.subr.bf16.mxu1 %v4508_v2 }
 0xf54   : > { %v2631_v32 = vmul.f32 %v4247_v31, %v4239_v17  ;;  %v4097_v17 = vpack.c.bf16 %v3627_v16, %v3626_v15 }
 0xf56   : > { %2635 = vst.msk [vmem:[%s5150_s27 + $0x18] sm:$0xff] %vm697_vm1, %v2631_v32  ;;  %3958 = vmatmul.mubr.msk.f32.vlgmr.msra.gmra.mrb[30].mxu0 %vm697_vm1, %v2631_v32  ;;  %4083 = vmatpush3.bf16.msra.mxu1 %v4082_v41  ;;  %v4103_v41 = vpack.c.bf16 %v3219_v38, %v3218_v37 }
 0xf57   : > { %3979 = vmatprep.mubr.msk.f32.mxu0 %vm4507_vm0, %v4506_v1  ;;  %4090 = vmatprep.subr.bf16.mxu1 %v4508_v2 }
 0xf58   : > { %4086 = vmatpush3.bf16.msra.mxu0 %v4085_v59 }
 0xf59   : > { %4087 = vmatprep.subr.bf16.mxu0 %v4508_v2 }
 0xf5c   : > { %4089 = vmatpush3.bf16.msra.mxu0 %v4088_v9 }
 0xf5d   : > { %4102 = vmatprep.subr.bf16.mxu0 %v4508_v2 }
 0xfb7   : > { %v2705_v33 = vpop.f32.mrb[18].mxu1 }
 0xfb8   : > { %v3944_v34 = vpop.f32.mrb[19].mxu1 }
0x1020   : > { %v2782_v42 = vpop.f32.mrb[28].mxu0 }
0x1021   : > { %2939 = vrot.lane.b32.xlu1 %v2782_v42, %s5448_s26  ;;  %v3949_v43 = vpop.f32.mrb[29].mxu0  ;;  %v3221_v42 = vld [vmem:[%s5385_s13 + $0x18] sm:$0xff] }
0x1022   : > { %v4106_v43 = vpack.c.bf16 %v3221_v42, %v3220_v39 }
0x1024   : > { %v2858_v44 = vpop.f32.mrb[20].mxu1 }
0x1025   : > { %2943 = vrot.lane.b32.xlu0 %v2858_v44, %s5449_s29  ;;  %v3954_v45 = vpop.f32.mrb[21].mxu1  ;;  %s5256_s29 = scalar_lea.sflag [#allocation13], %s3339_s3 }
0x1029   : > { %v2934_v46 = vpop.f32.mrb[30].mxu0 }
0x102a   : > { %2947 = vrot.lane.b32.xlu1 %v2934_v46, %s5450_s2  ;;  %v3959_v47 = vpop.f32.mrb[31].mxu0  ;;  %s4364_s2 = scalar_lea.vmem %s5254_s19, 512 }
0x102b   : > { %p4365_p8 = scmp.ne.s32.totalorder %s5254_s19, %s4364_s2 }
0x102d   : > { %p4366_p13 = pnand %p4365_p8, %p5454_p11 }
0x102f   : > { %p4367_p1 = pneg %p4366_p13 }
0x1093   : > { %v2940_v48 = vpop.permute.xlu1 %2939 }
0x1094   : > { %v2950_v50 = vsel %vm697_vm1, %v2705_v33, %v2940_v48 }
0x1097   : > { %v2944_v49 = vpop.permute.xlu0 %2943 }
0x1098   : > { %v2951_v51 = vsel %vm1774_vm5, %v2950_v50, %v2944_v49  ;;  %v3314_v49 = vld [vmem:[#allocation2] sm:$0x1] }
0x1099   : > { %v3631_v50 = vld [vmem:[%s5386_s14] ss:$0 sm:$0xff] }
0x109c   : > { %v2948_v52 = vpop.permute.xlu1 %2947 }
0x109d   : > { %v2952_v53 = vsel %vm1776_vm6, %v2951_v51, %v2948_v52 }
0x109e   : > { %3969 = vmatmul.mubr.msk.f32.vlgmr.msra.gmra.mrb[22].mxu1 %vm783_vm3, %v2952_v53  ;;  %v3633_v53 = vld [vmem:[%s5452_s0] ss:$0 sm:$0xff]  ;;  %s4370_s0 = scalar_lea.vmem %s4369_s28, 1024 }
0x109f   : > { %3998 = vmatprep.mubr.msk.f32.mxu1 %vm4507_vm0, %v4506_v1  ;;  %p4372_p9 = scmp.lt.s32.totalorder %s4370_s0, %s4364_s2 }
0x10a1   : > { %p4373_p5 = por %p4372_p9, %p4371_p6 }
0x10a3   : > { %p4374_p0 = pnand %p4373_p5, %p4367_p1 }
0x1171   : > { %v3027_v54 = vpop.f32.mrb[22].mxu1 }
0x1172   : > { %v3028_v55 = vadd.f32 %v3027_v54, %v5073_v21  ;;  %v3970_v60 = vpop.f32.mrb[23].mxu1  ;;  %v3622_v21 = vld [vmem:[%s5384_s12 + $0x40] sm:$0xff] }
0x1173   : > { %v4091_v12 = vpack.c.bf16 %v3623_v10, %v3622_v21 }
0x1174   : > { %v3031_v61 = vsel %vm783_vm3, %v3028_v55, 0.0 }
0x1175   : > { %3032 = vadd.xlane.f32.xlu0 %v3031_v61  ;;  %4092 = vmatpush3.bf16.msra.mxu1 %v4091_v12 }
0x1176   : > { %4093 = vmatprep.subr.bf16.mxu1 %v4508_v2 }
0x1179   : > { %4095 = vmatpush3.bf16.msra.mxu1 %v4094_v14 }
0x117a   : > { %4096 = vmatprep.subr.bf16.mxu1 %v4508_v2 }
0x117d   : > { %4098 = vmatpush3.bf16.msra.mxu1 %v4097_v17 }
0x117e   : > { %4099 = vmatprep.subr.bf16.mxu1 %v4508_v2 }
0x1181   : > { %4101 = vmatpush3.bf16.msra.mxu1 %v4100_v26 }
0x1202   : > { %v3033_v62 = vpop.xlane.xlu0 %3032 }
0x1203   : > { %v3034_v63 = vmul.f32 0.03125, %v3033_v62 }
0x1205   : > { %v3035_v0 = vsub.f32 %v3028_v55, %v3034_v63 }
0x1207   : > { %v3036_v3 = vmul.f32 %v3035_v0, %v3035_v0 }
0x1209   : > { %v3037_v4 = vsel %vm783_vm3, %v3036_v3, 0.0 }
0x120a   : > { %3038 = vadd.xlane.f32.xlu1 %v3037_v4 }
0x1297   : > { %v3039_v18 = vpop.xlane.xlu1 %3038 }
0x1298   : > { %v3040_v19 = vmul.f32 0.03125, %v3039_v18 }
0x129a   : > { %v3041_v20 = vadd.f32 1e-05, %v3040_v19 }
0x129c   : > { %4248 = vrsqrt.f32 %v3041_v20 }
0x12a6   : > { %v4249_v22 = vpop.eup %4248 }
0x12a7   : > { %v3043_v23 = vmul.f32 %v4249_v22, %v3035_v0 }
0x12a9   : > { %3980 = vmatmul.mubr.msk.f32.vlgmr.msra.gmra.mrb[32].mxu0 %vm783_vm3, %v3043_v23 }
0x12aa   : > { %4009 = vmatprep.mubr.msk.f32.mxu0 %vm4507_vm0, %v4506_v1  ;;  %4104 = vmatpush3.bf16.msra.mxu0 %v4103_v41 }
0x12ab   : > { %4105 = vmatprep.subr.bf16.mxu0 %v4508_v2 }
0x12ae   : > { %4107 = vmatpush3.bf16.msra.mxu0 %v4106_v43 }
0x137c   : > { %v3118_v27 = vpop.f32.mrb[32].mxu0 }
0x137d   : > { %v3122_v28 = vmax.f32 %v3118_v27, 0.0  ;;  %v3981_v29 = vpop.f32.mrb[33].mxu0 }
0x137f   : > { %3999 = vmatmul.mubr.msk.f32.vlgmr.msra.gmra.mrb[24].mxu1 %vm1955_vm7, %v3122_v28 }
0x1452   : > { %v3201_v30 = vpop.f32.mrb[24].mxu1 }
0x1453   : > { %v3202_v40 = vadd.f32 %v3201_v30, %v3043_v23  ;;  %v4000_v31 = vpop.f32.mrb[25].mxu1 }
0x1455   : > { %v3205_v1 = vsel %vm783_vm3, %v3202_v40, 0.0 }
0x1456   : > { %3206 = vadd.xlane.f32.xlu0 %v3205_v1 }
0x14e3   : > { %v3207_v32 = vpop.xlane.xlu0 %3206 }
0x14e4   : > { %v3208_v33 = vmul.f32 0.03125, %v3207_v32 }
0x14e6   : > { %v3209_v34 = vsub.f32 %v3202_v40, %v3208_v33 }
0x14e8   : > { %v3210_v35 = vmul.f32 %v3209_v34, %v3209_v34 }
0x14ea   : > { %v3211_v36 = vsel %vm783_vm3, %v3210_v35, 0.0 }
0x14eb   : > { %3212 = vadd.xlane.f32.xlu0 %v3211_v36 }
0x1501   : > { %3317 = vperm.xlu0 %4211, %v3314_v49  }
0x1578   : > { %v3213_v44 = vpop.xlane.xlu0 %3212 }
0x1579   : > { %v3214_v45 = vmul.f32 0.03125, %v3213_v44 }
0x157b   : > { %v3215_v46 = vadd.f32 1e-05, %v3214_v45 }
0x157d   : > { %4250 = vrsqrt.f32 %v3215_v46 }
0x1587   : > { %v4251_v47 = vpop.eup %4250 }
0x1588   : > { %v3217_v48 = vmul.f32 %v4251_v47, %v3209_v34 }
0x158a   : > { %4010 = vmatmul.mubr.msk.f32.vlgmr.msra.gmra.mrb[34].mxu0 %vm783_vm3, %v3217_v48 }
0x165d   : > { %v3298_v2 = vpop.f32.mrb[34].mxu0 }
0x165e   : > { %v3299_v51 = vadd.f32 %v3631_v50, %v3298_v2  ;;  %v4011_v52 = vpop.f32.mrb[35].mxu0 }
0x1660   : > { %v3302_v54 = vmax.f32 %v3299_v51, 0.0 }
0x1662   : > { %v3310_v55 = vmul.f32 %v3633_v53, %v3302_v54 }
0x1664   : > { %v3311_v60 = vsel %vm1774_vm5, %v3310_v55, 0.0 }
0x1665   : > { %3312 = vadd.xlane.f32.xlu1 %v3311_v60 }
0x1666   : > { %4377 = shalt.err (!%p4374_p0)
}
0x1667   : > { %s4378_s20 = scalar_lea.hbm %s5251_s18, 512  ;;  %s4382_s1 = scalar_lea.hbm %s5453_s23, 1024 }
0x1668   : > { %p4379_p10 = scmp.ne.s32.totalorder %s5251_s18, %s4378_s20  ;;  %p4383_p4 = scmp.lt.u32.totalorder %s5251_s18, %s5453_s23 }
0x1669   : > { %p4384_p12 = scmp.lt.u32.totalorder %s4382_s1, %s4378_s20  ;;  %p4386_p8 = scmp.lt.u32.totalorder %s4378_s20, %s5251_s18 }
0x166a   : > { %p4380_p2 = pnand %p4379_p10, %p5454_p11 }
0x166b   : > { %p4385_p7 = por %p4384_p12, %p4383_p4 }
0x166c   : > { %p4381_p3 = pneg %p4380_p2 }
0x166d   : > { %p4387_p13 = por %p4386_p8, %p4385_p7 }
0x166f   : > { %p4388_p1 = pnand %p4387_p13, %p4381_p3 }
0x1671   : > { %4391 = shalt.err (!%p4388_p1)
}
0x1672   : > { %s4517_s2 = smov 128   ;;  %s5455_s20 = sld [smem:[#allocation36_spill]] }
0x1673   : > { %4125 = dma.vmem_to_hbm [thread:$0]  (%p5454_p11), %s5254_s19, 512, %s5251_s18, %s5256_s29, %s4517_s2, %s4517_s2, %s5448_s26  }
0x1674   : > { %s3387_s22 = sshll.u32 %s5150_s27, 4  ;;  %s4518_s4 = smov [#allocation14]   ;;  %s5291_s22 = int_to_ptr.vmem [resolvable:$true] %s3387_s22 }
0x1675   : > { %s4392_s28 = scalar_lea.vmem %s5291_s22, 512  ;;  %s4396_s5 = sshll.u32 %s4518_s4, 4  ;;  %s4397_s5 = int_to_ptr.vmem [resolvable:$false] %s4396_s5 }
0x1676   : > { %p4393_p6 = scmp.ne.s32.totalorder %s5291_s22, %s4392_s28  ;;  %s4398_s18 = scalar_lea.vmem %s4397_s5, 1024 }
0x1677   : > { %p4399_p0 = scmp.lt.s32.totalorder %s5291_s22, %s4397_s5  ;;  %p4400_p10 = scmp.lt.s32.totalorder %s4398_s18, %s4392_s28 }
0x1678   : > { %s5456_s30 = smov %s5455_s20  ;;  %s5288_s1 = scalar_lea.hbm %s5455_s20, %s3643_s25 }
0x1679   : > { %p4394_p9 = pnand %p4393_p6, %p5454_p11  ;;  %p4401_p2 = por %p4400_p10, %p4399_p0 }
0x167b   : > { %p4395_p5 = pneg %p4394_p9 }
0x167d   : > { %p4402_p3 = pnand %p4401_p2, %p4395_p5 }
0x167f   : > { %4405 = shalt.err (!%p4402_p3)
}
0x1680   : > { %s4406_s27 = scalar_lea.hbm %s5288_s1, 512  ;;  %s4410_s4 = scalar_lea.hbm %s5456_s30, 1024 }
0x1681   : > { %p4407_p4 = scmp.ne.s32.totalorder %s5288_s1, %s4406_s27  ;;  %p4411_p8 = scmp.lt.u32.totalorder %s5288_s1, %s5456_s30 }
0x1682   : > { %p4412_p13 = scmp.lt.u32.totalorder %s4410_s4, %s4406_s27  ;;  %p4414_p6 = scmp.lt.u32.totalorder %s4406_s27, %s5288_s1 }
0x1683   : > { %p4408_p12 = pnand %p4407_p4, %p5454_p11 }
0x1684   : > { %p4413_p1 = por %p4412_p13, %p4411_p8 }
0x1685   : > { %p4409_p7 = pneg %p4408_p12 }
0x1686   : > { %p4415_p9 = por %p4414_p6, %p4413_p1 }
0x1688   : > { %p4416_p5 = pnand %p4415_p9, %p4409_p7 }
0x168a   : > { %4419 = shalt.err (!%p4416_p5)
}
0x168b   : > { %4126 = dma.vmem_to_hbm [thread:$0]  (%p5454_p11), %s5291_s22, 512, %s5288_s1, %s5256_s29, %s4517_s2, %s4517_s2, %s5448_s26   ;;  %v3318_v61 = vpop.permute.xlu0 %3317  ;;  %v3327_v62 = vand.u32 127, %v1402_v56  ;;  %vm3333_vm8 = vcmask 57344  }
0x168c   : > { %v3323_v63 = vrot.slane %v3318_v61, %v1404_v58  ;;  %s3636_s3 = sshll.u32 %s4644_s16, 4  ;;  %s666_s20 = scalar_lea.vmem [#allocation11], %s4958_s24 }
0x168d   : > { %v3330_v0 = vsub.s32 %v3327_v62, %v4925_v57  ;;  %s3358_s28 = sshll.u32 %s666_s20, 4  ;;  %s5457_s25 = sld [smem:[#allocation34_spill]]  ;;  %s5329_s28 = int_to_ptr.vmem [resolvable:$true] %s3358_s28 }
0x168e   : > { %s3336_s29 = scalar_lea.sflag [#allocation5], %s4958_s24  ;;  %s4420_s2 = scalar_lea.vmem %s5329_s28, 16 }
0x168f   : > { %p4421_p0 = scmp.ne.s32.totalorder %s5329_s28, %s4420_s2  ;;  %s4519_s16 = smov [#allocation11]  }
0x1690   : > { %s4424_s1 = sshll.u32 %s4519_s16, 4  ;;  %s4425_s1 = int_to_ptr.vmem [resolvable:$false] %s4424_s1 }
0x1691   : > { %p4422_p10 = pnand %p4421_p0, %p5454_p11  ;;  %s4426_s22 = scalar_lea.vmem %s4425_s1, 32 }
0x1692   : > { %p4427_p3 = scmp.lt.s32.totalorder %s5329_s28, %s4425_s1  ;;  %p4428_p4 = scmp.lt.s32.totalorder %s4426_s22, %s4420_s2 }
0x1693   : > { %s5327_s26 = scalar_lea.hbm %s5457_s25, %s3636_s3  ;;  %p4423_p2 = pneg %p4422_p10 }
0x1694   : > { %p4429_p12 = por %p4428_p4, %p4427_p3 }
0x1696   : > { %p4430_p7 = pnand %p4429_p12, %p4423_p2 }
0x16f2   : > { %v3313_v3 = vpop.xlane.xlu1 %3312 }
0x16f3   : > { %v3324_v4 = vadd.f32 %v3323_v63, %v3313_v3 }
0x16f5   : > { %v3331_v5 = vrot.slane %v3324_v4, %v3330_v0 }
0x16f7   : > { %3334 = vst.msk [vmem:[%s666_s20] sm:$0x1] %vm3333_vm8, %v3331_v5 }
0x16f8   : > { %4433 = shalt.err (!%p4430_p7)
}
0x16f9   : > { %s4434_s24 = scalar_lea.hbm %s5327_s26, 16  ;;  %s4438_s0 = scalar_lea.hbm %s5457_s25, 32 }
0x16fa   : > { %p4435_p8 = scmp.ne.s32.totalorder %s5327_s26, %s4434_s24  ;;  %p4439_p6 = scmp.lt.u32.totalorder %s5327_s26, %s5457_s25 }
0x16fb   : > { %p4440_p9 = scmp.lt.u32.totalorder %s4438_s0, %s4434_s24  ;;  %p4442_p0 = scmp.lt.u32.totalorder %s4434_s24, %s5327_s26 }
0x16fc   : > { %p4436_p13 = pnand %p4435_p8, %p5454_p11 }
0x16fd   : > { %p4441_p5 = por %p4440_p9, %p4439_p6 }
0x16fe   : > { %p4437_p1 = pneg %p4436_p13 }
0x16ff   : > { %p4443_p10 = por %p4442_p0, %p4441_p5 }
0x1701   : > { %p4444_p2 = pnand %p4443_p10, %p4437_p1 }
0x1703   : > { %4447 = shalt.err (!%p4444_p2)
}
0x1704   : > { %4124 = dma.vmem_to_hbm [thread:$0]  (%p5454_p11), %s5329_s28, 16, %s5327_s26, %s3336_s29  }
0x1705 PF: > { %s5458_s20 = sld [smem:[#allocation22_spill]]  ;;  %s5459_s18 = sld [smem:[#allocation20_spill]] }
0x1706   : > { %s5460_s27 = sld [smem:[#allocation26_spill]] }
0x170b   : > { %p4161_p3 = scmp.ge.s32.totalorder %s5458_s20, 2  ;;  %s3402_s2 = sand.u32 1, %s5459_s18  }
0x170c   : > { %p5461_p4 = scmp.ne.s32.totalorder %s5460_s27, 0  ;;  %s3403_s16 = scalar_lea.sflag [#allocation5], %s3402_s2 }
0x170e   : > { %p4144_p12 = pnand %p4161_p3, %p5461_p4 }
0x1710   : > { %4477 = dma.done.wait (!%p4144_p12), %s3403_s16, 16  }
0x1711   : > { %4479 = vsyncadd (!%p4144_p12), %s3403_s16, 4294967280  ;;  %s5462_s1 = sadd.s32 4294967294, %s5458_s20  }
0x1712   : > { %s3410_s22 = sand.u32 1, %s5462_s1  }
0x1713   : > { %s3411_s24 = scalar_lea.sflag [#allocation13], %s3410_s22 }
0x1714   : > { %4481 = dma.done.wait (!%p4144_p12), %s3411_s24, 1024  }
0x1715   : > { %4483 = vsyncadd (!%p4144_p12), %s3411_s24, 4294966272  ;;  %s5463_s22 = sld [smem:[#allocation23_spill]]  ;;  %s5464_s15 = sld [smem:[#allocation21_spill]] }
0x1716   : > { %s5465_s1 = sld [smem:[#allocation24_spill]]  ;;  %s5466_s20 = smov %s4490_s21 }
0x171b   : > { %p38_p11 = scmp.ge.s32.totalorder %s5463_s22, 4   ;;  %s5467_s21 = smov %s5464_s15 }
0x171d   :  { %40 = sbr.rel (!%p38_p11) target bundleno = 19 (0x13), region = 181 }
0x1724   :  { %3425 = vsyncpa [#allocation4], 1 }
0x1725   :  { %3427 = vsyncpa [#allocation4 + $0x1], 1 }
0x1726   :  { %3428 = vsyncpa [#allocation7], 1 }
0x1727   :  { %3429 = vsyncpa [#allocation10], 1 }
0x1728   :  { %3430 = vsyncpa [#allocation5], 1 }
0x1729   :  { %3432 = vsyncpa [#allocation5 + $0x1], 1 }
0x172a   :  { %3433 = vsyncpa [#allocation13], 1 }
0x172b   :  { %3435 = vsyncpa [#allocation13 + $0x1], 1 }

</bundles_post_ra>
